<compile_context>
chip_gen: v5e
topology: v5e:2x2
jax: 0.10.0
libtpu: 0.0.40
codegen_flags: <defaults>
</compile_context>

<pallas_src>
import functools

import jax
import jax.numpy as jnp
from jax import lax
from jax.experimental import pallas as pl
from jax.experimental.pallas import tpu as pltpu

# ---- small, MetaHIN-consistent config -------------------------------------
N = 8               # support-set size
ITEM_DIM = 32       # item embedding dim
MP_DIM = 32         # metapath-enhanced user embedding dim
D_CAT = ITEM_DIM + MP_DIM
H1 = 32             # first_fc_hidden_dim
H2 = 32             # second_fc_hidden_dim
LOCAL_LR = 0.01     # config['local_lr']
LOCAL_UPDATE = 3    # config['local_update']
LANES = 128         # lane width of a vreg
TB_MAX = 8          # max tasks per grid step


def _hml_block_kernel(xy_ref, wmat_ref, small_ref, owmat_ref, osmall_ref, *,
                      d_cat, h1, h2, local_lr, local_update):
    """One grid step = TB tasks: `local_update` SGD steps of the MetaLearner MLP.

    xy_ref    : (TB, n, 128)   lanes [0:d_cat)=x, [d_cat]=y, rest zero-pad
    wmat_ref  : (TB|1, h1, 128) lanes [0:d_cat)=w1, [d_cat:d_cat+h1)=w2
    small_ref : (TB|1, 1, 128)  lanes [0:h1)=b1, [h1:h1+h2)=b2,
                                [h1+h2:h1+2h2)=w3, [h1+2h2]=b3
    """
    xy = xy_ref[...]
    tb, n, _ = xy.shape
    x = xy[:, :, :d_cat]                          # (TB, n, d_cat)
    y = xy[:, :, d_cat:d_cat + 1]                 # (TB, n, 1)

    wmat = wmat_ref[...]
    small = small_ref[...]
    if wmat.shape[0] != tb:                       # shared-weights constant block
        wmat = jnp.broadcast_to(wmat, (tb,) + wmat.shape[1:])
        small = jnp.broadcast_to(small, (tb,) + small.shape[1:])

    w1 = wmat[:, :, :d_cat]                       # (TB, h1, d_cat)
    w2 = wmat[:, :h2, d_cat:d_cat + h1]           # (TB, h2, h1)
    b1 = small[:, :, :h1]                         # (TB, 1, h1)
    b2 = small[:, :, h1:h1 + h2]                  # (TB, 1, h2)
    w3 = small[:, :, h1 + h2:h1 + 2 * h2]         # (TB, 1, h2)
    b3 = small[:, :, h1 + 2 * h2:h1 + 2 * h2 + 1]  # (TB, 1, 1)

    # MSE 2/N scaling and local_lr folded once (all grads are linear in d_out).
    scale = jnp.float32(2.0 * local_lr / n)

    # task-batched dot_generals, no in-kernel transposes:
    dn_fwd = (((2,), (2,)), ((0,), (0,)))   # (t,n,k)·(t,h,k) -> (t,n,h)
    dn_dw = (((1,), (1,)), ((0,), (0,)))    # (t,n,g)·(t,n,h) -> (t,g,h)
    dn_dh = (((2,), (1,)), ((0,), (0,)))    # (t,n,g)·(t,g,h) -> (t,n,h)

    for _ in range(local_update):           # keep unrolled (short fixed chain)
        # ---- forward: relu(linear) -> relu(linear) -> linear ----
        z1 = lax.dot_general(x, w1, dn_fwd, preferred_element_type=jnp.float32) + b1
        h1a = jnp.maximum(z1, 0.0)
        z2 = lax.dot_general(h1a, w2, dn_fwd, preferred_element_type=jnp.float32) + b2
        h2a = jnp.maximum(z2, 0.0)
        # last layer is rank-1 -> VPU/XLU, not MXU
        out = jnp.sum(h2a * w3, axis=2, keepdims=True) + b3        # (TB, n, 1)

        # ---- analytic backprop of MSE, pre-scaled by local_lr ----
        d_out = scale * (out - y)                                   # (TB, n, 1)
        dw3 = jnp.sum(d_out * h2a, axis=1, keepdims=True)           # (TB, 1, h2)
        db3 = jnp.sum(d_out, axis=1, keepdims=True)                 # (TB, 1, 1)
        dh2 = d_out * w3                                            # (TB, n, h2)
        dz2 = jnp.where(z2 > 0.0, dh2, 0.0)
        dw2 = lax.dot_general(dz2, h1a, dn_dw,
                              preferred_element_type=jnp.float32)   # (TB, h2, h1)
        db2 = jnp.sum(dz2, axis=1, keepdims=True)                   # (TB, 1, h2)
        dh1 = lax.dot_general(dz2, w2, dn_dh,
                              preferred_element_type=jnp.float32)   # (TB, n, h1)
        dz1 = jnp.where(z1 > 0.0, dh1, 0.0)
        dw1 = lax.dot_general(dz1, x, dn_dw,
                              preferred_element_type=jnp.float32)   # (TB, h1, d_cat)
        db1 = jnp.sum(dz1, axis=1, keepdims=True)                   # (TB, 1, h1)

        # ---- SGD step (grads already carry local_lr) ----
        w1 = w1 - dw1
        w2 = w2 - dw2
        w3 = w3 - dw3
        b1 = b1 - db1
        b2 = b2 - db2
        b3 = b3 - db3

    # ---- lane-dense write-back: one full 128-lane store per output ----
    wparts = [w1, w2]
    wpad = LANES - (d_cat + h1)
    if wpad > 0:
        wparts.append(jnp.zeros((tb, h1, wpad), jnp.float32))
    owmat_ref[...] = jnp.concatenate(wparts, axis=-1)

    sparts = [b1, b2, w3, b3]
    spad = LANES - (h1 + 2 * h2 + 1)
    if spad > 0:
        sparts.append(jnp.zeros((tb, 1, spad), jnp.float32))
    osmall_ref[...] = jnp.concatenate(sparts, axis=-1)


def _choose_task_block(t):
    """Tasks per grid step: amortize step overhead, but keep >=2 blocks for v7x."""
    if t <= 1:
        return 1
    if t <= 2 * TB_MAX:
        return pl.cdiv(t, 2)
    return TB_MAX


def _hml_pallas(xy, wmat, small, *, per_task, tb, d_cat, h1, h2,
                local_lr, local_update):
    tp, n, _ = xy.shape
    grid = (tp // tb,)
    kern = functools.partial(_hml_block_kernel, d_cat=d_cat, h1=h1, h2=h2,
                             local_lr=local_lr, local_update=local_update)

    xy_spec = pl.BlockSpec((tb, n, LANES), lambda t: (t, 0, 0))
    ow_spec = pl.BlockSpec((tb, h1, LANES), lambda t: (t, 0, 0))
    os_spec = pl.BlockSpec((tb, 1, LANES), lambda t: (t, 0, 0))

    if per_task:
        w_spec, s_spec = ow_spec, os_spec
        # alias packed weights (inputs 1,2) onto the fast-weight outputs (0,1)
        aliases = {1: 0, 2: 1}
    else:
        # shared weights: constant block index -> fetched once, stays resident;
        # no HBM-materialized broadcast copies, no aliasing.
        w_spec = pl.BlockSpec((1, h1, LANES), lambda t: (0, 0, 0))
        s_spec = pl.BlockSpec((1, 1, LANES), lambda t: (0, 0, 0))
        aliases = {}

    return pl.pallas_call(
        kern,
        out_shape=(jax.ShapeDtypeStruct((tp, h1, LANES), jnp.float32),
                   jax.ShapeDtypeStruct((tp, 1, LANES), jnp.float32)),
        grid=grid,
        in_specs=(xy_spec, w_spec, s_spec),
        out_specs=(ow_spec, os_spec),
        input_output_aliases=aliases,
        compiler_params=pltpu.CompilerParams(
            dimension_semantics=("parallel",)),
    )(xy, wmat, small)


@jax.jit
def hml_forward(support_user_emb, support_item_emb, support_set_y,
                support_mp_user_emb, vars_dict):
    """Pallas implementation of HML.forward: returns the fast-weight dict.

    Accepts either a single task (inputs (N, D), weights un-batched, the
    original per-task torch call) or a whole meta-batch with a leading task
    axis T (inputs (T, N, D); weights either per-task (T, ...) or shared).
    """
    # support_user_emb is accepted for API fidelity but, exactly like MetaHIN's
    # MetaLearner.forward, it is not used in the computation.
    del support_user_emb

    item = jnp.asarray(support_item_emb, jnp.float32)
    mp = jnp.asarray(support_mp_user_emb, jnp.float32)
    y = jnp.asarray(support_set_y, jnp.float32)

    single = item.ndim == 2
    if single:
        item, mp, y = item[None], mp[None], y[None]
    if y.ndim == 2:                                   # (T, n) -> (T, n, 1)
        y = y[..., None]

    t, n, d_item = item.shape
    d_mp = mp.shape[-1]
    d_cat = d_item + d_mp

    w1 = jnp.asarray(vars_dict['ml_fc_w1'], jnp.float32)
    b1 = jnp.asarray(vars_dict['ml_fc_b1'], jnp.float32)
    w2 = jnp.asarray(vars_dict['ml_fc_w2'], jnp.float32)
    b2 = jnp.asarray(vars_dict['ml_fc_b2'], jnp.float32)
    w3 = jnp.asarray(vars_dict['ml_fc_w3'], jnp.float32)
    b3 = jnp.asarray(vars_dict['ml_fc_b3'], jnp.float32)
    per_task = (w1.ndim == 3)                         # e.g. per-task f_fast_weights

    h1 = w1.shape[-2]
    h2 = w2.shape[-2]
    assert h1 == h2, "packed layout assumes first/second hidden dims equal"
    assert d_cat + 1 <= LANES and d_cat + h1 <= LANES and h1 + 2 * h2 + 1 <= LANES
    assert n % 8 == 0, "support-set size must be a multiple of 8 (sublane tile)"

    # ---- lane-dense packing, done once in the wrapper -----------------------
    xy = jnp.concatenate(
        [item, mp, y,
         jnp.zeros((t, n, LANES - (d_cat + 1)), jnp.float32)], axis=-1)

    def _pack(w1_, b1_, w2_, b2_, w3_, b3_):
        lead = w1_.shape[:-2]
        wmat_ = jnp.concatenate(
            [w1_, w2_,
             jnp.zeros(lead + (h1, LANES - (d_cat + h1)), jnp.float32)], axis=-1)
        small_ = jnp.concatenate(
            [b1_[..., None, :], b2_[..., None, :], w3_, b3_[..., None, :],
             jnp.zeros(lead + (1, LANES - (h1 + 2 * h2 + 1)), jnp.float32)],
            axis=-1)
        return wmat_, small_

    wmat, small = _pack(w1, b1, w2, b2, w3, b3)
    if not per_task:
        wmat, small = wmat[None], small[None]         # (1, ...) constant block

    # ---- task blocking: TB tasks per grid step ------------------------------
    tb = _choose_task_block(t)
    tp = pl.cdiv(t, tb) * tb
    if tp != t:                                       # pad with benign zero tasks
        xy = jnp.concatenate(
            [xy, jnp.zeros((tp - t,) + xy.shape[1:], jnp.float32)], axis=0)
        if per_task:
            wmat = jnp.concatenate(
                [wmat, jnp.zeros((tp - t,) + wmat.shape[1:], jnp.float32)], axis=0)
            small = jnp.concatenate(
                [small, jnp.zeros((tp - t,) + small.shape[1:], jnp.float32)], axis=0)

    owmat, osmall = _hml_pallas(xy, wmat, small, per_task=per_task, tb=tb,
                                d_cat=d_cat, h1=h1, h2=h2,
                                local_lr=LOCAL_LR, local_update=LOCAL_UPDATE)
    owmat = owmat[:t]
    osmall = osmall[:t]

    fw1 = owmat[:, :, :d_cat]
    fw2 = owmat[:, :h2, d_cat:d_cat + h1]
    fb1 = osmall[:, 0, :h1]
    fb2 = osmall[:, 0, h1:h1 + h2]
    fw3 = osmall[:, :, h1 + h2:h1 + 2 * h2]
    fb3 = osmall[:, 0, h1 + 2 * h2:h1 + 2 * h2 + 1]

    if single:
        fw1, fb1, fw2, fb2, fw3, fb3 = (a[0] for a in (fw1, fb1, fw2, fb2, fw3, fb3))

    return {'ml_fc_w1': fw1, 'ml_fc_b1': fb1,
            'ml_fc_w2': fw2, 'ml_fc_b2': fb2,
            'ml_fc_w3': fw3, 'ml_fc_b3': fb3}


# ---------------- pure-JAX reference (autograd), for verification -----------
def _meta_learner_ref(params, item_emb, mp_emb):
    x = jnp.concatenate([item_emb, mp_emb], axis=1)
    h1 = jax.nn.relu(x @ params['ml_fc_w1'].T + params['ml_fc_b1'])
    h2 = jax.nn.relu(h1 @ params['ml_fc_w2'].T + params['ml_fc_b2'])
    return h2 @ params['ml_fc_w3'].T + params['ml_fc_b3']            # (N, 1)


def _ref_inner_loop(item_emb, mp_emb, y, params):
    def loss_fn(p):
        pred = _meta_learner_ref(p, item_emb, mp_emb)
        return jnp.mean((pred - y) ** 2)
    fast = dict(params)
    for _ in range(LOCAL_UPDATE):
        g = jax.grad(loss_fn)(fast)
        fast = {k: fast[k] - LOCAL_LR * g[k] for k in fast}
    return fast


def _xavier_normal(key, shape):
    fan_out, fan_in = shape[-2], shape[-1]
    std = (2.0 / (fan_in + fan_out)) ** 0.5
    return std * jax.random.normal(key, shape, dtype=jnp.float32)


if __name__ == "__main__":
    T = 4   # meta-batch of tasks handled in one gridded kernel call
    key = jax.random.PRNGKey(0)
    (k_user, k_item, k_mp, k_y,
     k_w1, k_w2, k_w3, k_b1, k_b2, k_b3) = jax.random.split(key, 10)

    support_user_emb = jax.random.normal(k_user, (T, N, ITEM_DIM), dtype=jnp.float32)
    support_item_emb = jax.random.normal(k_item, (T, N, ITEM_DIM), dtype=jnp.float32)
    support_mp_user_emb = jax.random.normal(k_mp, (T, N, MP_DIM), dtype=jnp.float32)
    support_set_y = jax.random.uniform(k_y, (T, N, 1), dtype=jnp.float32,
                                       minval=1.0, maxval=5.0)

    # per-task MetaLearner parameters (as produced by f_fast_weights in mp_update)
    vars_dict = {
        'ml_fc_w1': _xavier_normal(k_w1, (T, H1, D_CAT)),
        'ml_fc_b1': 0.1 * jax.random.normal(k_b1, (T, H1), dtype=jnp.float32),
        'ml_fc_w2': _xavier_normal(k_w2, (T, H2, H1)),
        'ml_fc_b2': 0.1 * jax.random.normal(k_b2, (T, H2), dtype=jnp.float32),
        'ml_fc_w3': _xavier_normal(k_w3, (T, 1, H2)),
        'ml_fc_b3': 0.1 * jax.random.normal(k_b3, (T, 1), dtype=jnp.float32),
    }

    # --- 1) batched call, per-task weights (aliased outputs) ----------------
    fast_weights = hml_forward(support_user_emb, support_item_emb,
                               support_set_y, support_mp_user_emb, vars_dict)
    jax.block_until_ready(fast_weights)
    for t in range(T):
        params_t = {k: v[t] for k, v in vars_dict.items()}
        ref_t = _ref_inner_loop(support_item_emb[t], support_mp_user_emb[t],
                                support_set_y[t], params_t)
        for k in params_t:
            assert fast_weights[k][t].shape == params_t[k].shape, (t, k)
            assert jnp.allclose(fast_weights[k][t], ref_t[k],
                                atol=1e-4, rtol=1e-4), (t, k)

    # --- 2) single-task call (original per-task HML.forward API) ------------
    params_0 = {k: v[0] for k, v in vars_dict.items()}
    single_fast = hml_forward(support_user_emb[0], support_item_emb[0],
                              support_set_y[0], support_mp_user_emb[0], params_0)
    jax.block_until_ready(single_fast)
    ref_0 = _ref_inner_loop(support_item_emb[0], support_mp_user_emb[0],
                            support_set_y[0], params_0)
    for k in params_0:
        assert single_fast[k].shape == params_0[k].shape, k
        assert jnp.allclose(single_fast[k], ref_0[k], atol=1e-4, rtol=1e-4), k

    # --- 3) batched tasks with SHARED (unbatched) weights + odd T (padding) --
    T3 = 3
    shared_fast = hml_forward(support_user_emb[:T3], support_item_emb[:T3],
                              support_set_y[:T3], support_mp_user_emb[:T3],
                              params_0)
    jax.block_until_ready(shared_fast)
    for t in range(T3):
        ref_t = _ref_inner_loop(support_item_emb[t], support_mp_user_emb[t],
                                support_set_y[t], params_0)
        for k in params_0:
            assert shared_fast[k][t].shape == params_0[k].shape, (t, k)
            assert jnp.allclose(shared_fast[k][t], ref_t[k],
                                atol=1e-4, rtol=1e-4), (t, k)

    print("KERNEL_OK")
</pallas_src>

<mosaic_0001>
module attributes {stable_mosaic.version = 11 : i64} {
  func.func @_hml_block_kernel(%arg0: i32, %arg1: memref<2x8x128xf32, #tpu.memory_space<vmem>>, %arg2: memref<2x32x128xf32, #tpu.memory_space<vmem>>, %arg3: memref<2x1x128xf32, #tpu.memory_space<vmem>>, %arg4: memref<2x32x128xf32, #tpu.memory_space<vmem>>, %arg5: memref<2x1x128xf32, #tpu.memory_space<vmem>>) attributes {dimension_semantics = [#tpu.dimension_semantics<parallel>], iteration_bounds = array<i64: 2>, scalar_prefetch = 0 : i64, scratch_operands = 0 : i64, tpu.core_type = #tpu.core_type<tc>, window_params = [{transform_indices = @transform_0, window_bounds = array<i64: 2, 8, 128>}, {transform_indices = @transform_1, window_bounds = array<i64: 2, 32, 128>}, {transform_indices = @transform_2, window_bounds = array<i64: 2, 1, 128>}, {transform_indices = @transform_3, window_bounds = array<i64: 2, 32, 128>}, {transform_indices = @transform_4, window_bounds = array<i64: 2, 1, 128>}]} {
    %c0 = arith.constant 0 : index
    %c0_0 = arith.constant 0 : index
    %c0_1 = arith.constant 0 : index
    %0 = vector.load %arg1[%c0, %c0_0, %c0_1] : memref<2x8x128xf32, #tpu.memory_space<vmem>>, vector<2x8x128xf32>
    %1 = vector.extract_strided_slice %0 {offsets = [0, 0, 0], sizes = [2, 8, 64], strides = [1, 1, 1]} : vector<2x8x128xf32> to vector<2x8x64xf32>
    %2 = vector.extract_strided_slice %0 {offsets = [0, 0, 64], sizes = [2, 8, 1], strides = [1, 1, 1]} : vector<2x8x128xf32> to vector<2x8x1xf32>
    %c0_2 = arith.constant 0 : index
    %c0_3 = arith.constant 0 : index
    %c0_4 = arith.constant 0 : index
    %3 = vector.load %arg2[%c0_2, %c0_3, %c0_4] : memref<2x32x128xf32, #tpu.memory_space<vmem>>, vector<2x32x128xf32>
    %c0_5 = arith.constant 0 : index
    %c0_6 = arith.constant 0 : index
    %c0_7 = arith.constant 0 : index
    %4 = vector.load %arg3[%c0_5, %c0_6, %c0_7] : memref<2x1x128xf32, #tpu.memory_space<vmem>>, vector<2x1x128xf32>
    %5 = vector.extract_strided_slice %3 {offsets = [0, 0, 0], sizes = [2, 32, 64], strides = [1, 1, 1]} : vector<2x32x128xf32> to vector<2x32x64xf32>
    %6 = vector.extract_strided_slice %3 {offsets = [0, 0, 64], sizes = [2, 32, 32], strides = [1, 1, 1]} : vector<2x32x128xf32> to vector<2x32x32xf32>
    %7 = vector.extract_strided_slice %4 {offsets = [0, 0, 0], sizes = [2, 1, 32], strides = [1, 1, 1]} : vector<2x1x128xf32> to vector<2x1x32xf32>
    %8 = vector.extract_strided_slice %4 {offsets = [0, 0, 32], sizes = [2, 1, 32], strides = [1, 1, 1]} : vector<2x1x128xf32> to vector<2x1x32xf32>
    %9 = vector.extract_strided_slice %4 {offsets = [0, 0, 64], sizes = [2, 1, 32], strides = [1, 1, 1]} : vector<2x1x128xf32> to vector<2x1x32xf32>
    %10 = vector.extract_strided_slice %4 {offsets = [0, 0, 96], sizes = [2, 1, 1], strides = [1, 1, 1]} : vector<2x1x128xf32> to vector<2x1x1xf32>
    %cst = arith.constant dense<0.000000e+00> : vector<2x8x32xf32>
    %11 = tpu.matmul %1, %5, %cst {dimension_numbers = #tpu.dot_dimension_numbers<[2], [2], [1], [1], [0, 0, 0, 1, 1, 1], [0], [0]>} : vector<2x8x64xf32>, vector<2x32x64xf32>, vector<2x8x32xf32> -> vector<2x8x32xf32>
    %12 = vector.broadcast %7 : vector<2x1x32xf32> to vector<2x8x32xf32>
    %13 = arith.addf %11, %12 : vector<2x8x32xf32>
    %cst_8 = arith.constant 0.000000e+00 : f32
    %14 = vector.broadcast %cst_8 : f32 to vector<2x8x32xf32>
    %15 = arith.maximumf %13, %14 : vector<2x8x32xf32>
    %cst_9 = arith.constant dense<0.000000e+00> : vector<2x8x32xf32>
    %16 = tpu.matmul %15, %6, %cst_9 {dimension_numbers = #tpu.dot_dimension_numbers<[2], [2], [1], [1], [0, 0, 0, 1, 1, 1], [0], [0]>} : vector<2x8x32xf32>, vector<2x32x32xf32>, vector<2x8x32xf32> -> vector<2x8x32xf32>
    %17 = vector.broadcast %8 : vector<2x1x32xf32> to vector<2x8x32xf32>
    %18 = arith.addf %16, %17 : vector<2x8x32xf32>
    %cst_10 = arith.constant 0.000000e+00 : f32
    %19 = vector.broadcast %cst_10 : f32 to vector<2x8x32xf32>
    %20 = arith.maximumf %18, %19 : vector<2x8x32xf32>
    %21 = vector.broadcast %9 : vector<2x1x32xf32> to vector<2x8x32xf32>
    %22 = arith.mulf %20, %21 : vector<2x8x32xf32>
    %cst_11 = arith.constant dense<0.000000e+00> : vector<2x8xf32>
    %23 = vector.multi_reduction <add>, %22, %cst_11 [2] : vector<2x8x32xf32> to vector<2x8xf32>
    %24 = vector.shape_cast %23 : vector<2x8xf32> to vector<2x8x1xf32>
    %25 = vector.broadcast %10 : vector<2x1x1xf32> to vector<2x8x1xf32>
    %26 = arith.addf %24, %25 : vector<2x8x1xf32>
    %27 = arith.subf %26, %2 : vector<2x8x1xf32>
    %cst_12 = arith.constant 2.500000e-03 : f32
    %28 = vector.broadcast %cst_12 : f32 to vector<2x8x1xf32>
    %29 = arith.mulf %28, %27 : vector<2x8x1xf32>
    %30 = vector.broadcast %29 : vector<2x8x1xf32> to vector<2x8x32xf32>
    %31 = arith.mulf %30, %20 : vector<2x8x32xf32>
    %cst_13 = arith.constant dense<0.000000e+00> : vector<2x32xf32>
    %32 = vector.multi_reduction <add>, %31, %cst_13 [1] : vector<2x8x32xf32> to vector<2x32xf32>
    %33 = vector.shape_cast %32 : vector<2x32xf32> to vector<2x1x32xf32>
    %cst_14 = arith.constant dense<0.000000e+00> : vector<2x1xf32>
    %34 = vector.multi_reduction <add>, %29, %cst_14 [1] : vector<2x8x1xf32> to vector<2x1xf32>
    %35 = vector.shape_cast %34 : vector<2x1xf32> to vector<2x1x1xf32>
    %36 = vector.broadcast %29 : vector<2x8x1xf32> to vector<2x8x32xf32>
    %37 = vector.broadcast %9 : vector<2x1x32xf32> to vector<2x8x32xf32>
    %38 = arith.mulf %36, %37 : vector<2x8x32xf32>
    %cst_15 = arith.constant 0.000000e+00 : f32
    %39 = vector.broadcast %cst_15 : f32 to vector<2x8x32xf32>
    %40 = arith.cmpf ogt, %18, %39 : vector<2x8x32xf32>
    %cst_16 = arith.constant 0.000000e+00 : f32
    %41 = vector.broadcast %cst_16 : f32 to vector<2x8x32xf32>
    %42 = arith.select %40, %38, %41 : vector<2x8x32xi1>, vector<2x8x32xf32>
    %cst_17 = arith.constant dense<0.000000e+00> : vector<2x32x32xf32>
    %43 = tpu.matmul %42, %15, %cst_17 {dimension_numbers = #tpu.dot_dimension_numbers<[1], [1], [2], [2], [0, 0, 0, 2, 1, 2], [0], [0]>} : vector<2x8x32xf32>, vector<2x8x32xf32>, vector<2x32x32xf32> -> vector<2x32x32xf32>
    %cst_18 = arith.constant dense<0.000000e+00> : vector<2x32xf32>
    %44 = vector.multi_reduction <add>, %42, %cst_18 [1] : vector<2x8x32xf32> to vector<2x32xf32>
    %45 = vector.shape_cast %44 : vector<2x32xf32> to vector<2x1x32xf32>
    %cst_19 = arith.constant dense<0.000000e+00> : vector<2x8x32xf32>
    %46 = tpu.matmul %42, %6, %cst_19 {dimension_numbers = #tpu.dot_dimension_numbers<[2], [1], [1], [2], [0, 0, 0, 1, 1, 2], [0], [0]>} : vector<2x8x32xf32>, vector<2x32x32xf32>, vector<2x8x32xf32> -> vector<2x8x32xf32>
    %cst_20 = arith.constant 0.000000e+00 : f32
    %47 = vector.broadcast %cst_20 : f32 to vector<2x8x32xf32>
    %48 = arith.cmpf ogt, %13, %47 : vector<2x8x32xf32>
    %cst_21 = arith.constant 0.000000e+00 : f32
    %49 = vector.broadcast %cst_21 : f32 to vector<2x8x32xf32>
    %50 = arith.select %48, %46, %49 : vector<2x8x32xi1>, vector<2x8x32xf32>
    %cst_22 = arith.constant dense<0.000000e+00> : vector<2x32x64xf32>
    %51 = tpu.matmul %50, %1, %cst_22 {dimension_numbers = #tpu.dot_dimension_numbers<[1], [1], [2], [2], [0, 0, 0, 2, 1, 2], [0], [0]>} : vector<2x8x32xf32>, vector<2x8x64xf32>, vector<2x32x64xf32> -> vector<2x32x64xf32>
    %cst_23 = arith.constant dense<0.000000e+00> : vector<2x32xf32>
    %52 = vector.multi_reduction <add>, %50, %cst_23 [1] : vector<2x8x32xf32> to vector<2x32xf32>
    %53 = vector.shape_cast %52 : vector<2x32xf32> to vector<2x1x32xf32>
    %54 = arith.subf %5, %51 : vector<2x32x64xf32>
    %55 = arith.subf %6, %43 : vector<2x32x32xf32>
    %56 = arith.subf %9, %33 : vector<2x1x32xf32>
    %57 = arith.subf %7, %53 : vector<2x1x32xf32>
    %58 = arith.subf %8, %45 : vector<2x1x32xf32>
    %59 = arith.subf %10, %35 : vector<2x1x1xf32>
    %cst_24 = arith.constant dense<0.000000e+00> : vector<2x8x32xf32>
    %60 = tpu.matmul %1, %54, %cst_24 {dimension_numbers = #tpu.dot_dimension_numbers<[2], [2], [1], [1], [0, 0, 0, 1, 1, 1], [0], [0]>} : vector<2x8x64xf32>, vector<2x32x64xf32>, vector<2x8x32xf32> -> vector<2x8x32xf32>
    %61 = vector.broadcast %57 : vector<2x1x32xf32> to vector<2x8x32xf32>
    %62 = arith.addf %60, %61 : vector<2x8x32xf32>
    %cst_25 = arith.constant 0.000000e+00 : f32
    %63 = vector.broadcast %cst_25 : f32 to vector<2x8x32xf32>
    %64 = arith.maximumf %62, %63 : vector<2x8x32xf32>
    %cst_26 = arith.constant dense<0.000000e+00> : vector<2x8x32xf32>
    %65 = tpu.matmul %64, %55, %cst_26 {dimension_numbers = #tpu.dot_dimension_numbers<[2], [2], [1], [1], [0, 0, 0, 1, 1, 1], [0], [0]>} : vector<2x8x32xf32>, vector<2x32x32xf32>, vector<2x8x32xf32> -> vector<2x8x32xf32>
    %66 = vector.broadcast %58 : vector<2x1x32xf32> to vector<2x8x32xf32>
    %67 = arith.addf %65, %66 : vector<2x8x32xf32>
    %cst_27 = arith.constant 0.000000e+00 : f32
    %68 = vector.broadcast %cst_27 : f32 to vector<2x8x32xf32>
    %69 = arith.maximumf %67, %68 : vector<2x8x32xf32>
    %70 = vector.broadcast %56 : vector<2x1x32xf32> to vector<2x8x32xf32>
    %71 = arith.mulf %69, %70 : vector<2x8x32xf32>
    %cst_28 = arith.constant dense<0.000000e+00> : vector<2x8xf32>
    %72 = vector.multi_reduction <add>, %71, %cst_28 [2] : vector<2x8x32xf32> to vector<2x8xf32>
    %73 = vector.shape_cast %72 : vector<2x8xf32> to vector<2x8x1xf32>
    %74 = vector.broadcast %59 : vector<2x1x1xf32> to vector<2x8x1xf32>
    %75 = arith.addf %73, %74 : vector<2x8x1xf32>
    %76 = arith.subf %75, %2 : vector<2x8x1xf32>
    %cst_29 = arith.constant 2.500000e-03 : f32
    %77 = vector.broadcast %cst_29 : f32 to vector<2x8x1xf32>
    %78 = arith.mulf %77, %76 : vector<2x8x1xf32>
    %79 = vector.broadcast %78 : vector<2x8x1xf32> to vector<2x8x32xf32>
    %80 = arith.mulf %79, %69 : vector<2x8x32xf32>
    %cst_30 = arith.constant dense<0.000000e+00> : vector<2x32xf32>
    %81 = vector.multi_reduction <add>, %80, %cst_30 [1] : vector<2x8x32xf32> to vector<2x32xf32>
    %82 = vector.shape_cast %81 : vector<2x32xf32> to vector<2x1x32xf32>
    %cst_31 = arith.constant dense<0.000000e+00> : vector<2x1xf32>
    %83 = vector.multi_reduction <add>, %78, %cst_31 [1] : vector<2x8x1xf32> to vector<2x1xf32>
    %84 = vector.shape_cast %83 : vector<2x1xf32> to vector<2x1x1xf32>
    %85 = vector.broadcast %78 : vector<2x8x1xf32> to vector<2x8x32xf32>
    %86 = vector.broadcast %56 : vector<2x1x32xf32> to vector<2x8x32xf32>
    %87 = arith.mulf %85, %86 : vector<2x8x32xf32>
    %cst_32 = arith.constant 0.000000e+00 : f32
    %88 = vector.broadcast %cst_32 : f32 to vector<2x8x32xf32>
    %89 = arith.cmpf ogt, %67, %88 : vector<2x8x32xf32>
    %cst_33 = arith.constant 0.000000e+00 : f32
    %90 = vector.broadcast %cst_33 : f32 to vector<2x8x32xf32>
    %91 = arith.select %89, %87, %90 : vector<2x8x32xi1>, vector<2x8x32xf32>
    %cst_34 = arith.constant dense<0.000000e+00> : vector<2x32x32xf32>
    %92 = tpu.matmul %91, %64, %cst_34 {dimension_numbers = #tpu.dot_dimension_numbers<[1], [1], [2], [2], [0, 0, 0, 2, 1, 2], [0], [0]>} : vector<2x8x32xf32>, vector<2x8x32xf32>, vector<2x32x32xf32> -> vector<2x32x32xf32>
    %cst_35 = arith.constant dense<0.000000e+00> : vector<2x32xf32>
    %93 = vector.multi_reduction <add>, %91, %cst_35 [1] : vector<2x8x32xf32> to vector<2x32xf32>
    %94 = vector.shape_cast %93 : vector<2x32xf32> to vector<2x1x32xf32>
    %cst_36 = arith.constant dense<0.000000e+00> : vector<2x8x32xf32>
    %95 = tpu.matmul %91, %55, %cst_36 {dimension_numbers = #tpu.dot_dimension_numbers<[2], [1], [1], [2], [0, 0, 0, 1, 1, 2], [0], [0]>} : vector<2x8x32xf32>, vector<2x32x32xf32>, vector<2x8x32xf32> -> vector<2x8x32xf32>
    %cst_37 = arith.constant 0.000000e+00 : f32
    %96 = vector.broadcast %cst_37 : f32 to vector<2x8x32xf32>
    %97 = arith.cmpf ogt, %62, %96 : vector<2x8x32xf32>
    %cst_38 = arith.constant 0.000000e+00 : f32
    %98 = vector.broadcast %cst_38 : f32 to vector<2x8x32xf32>
    %99 = arith.select %97, %95, %98 : vector<2x8x32xi1>, vector<2x8x32xf32>
    %cst_39 = arith.constant dense<0.000000e+00> : vector<2x32x64xf32>
    %100 = tpu.matmul %99, %1, %cst_39 {dimension_numbers = #tpu.dot_dimension_numbers<[1], [1], [2], [2], [0, 0, 0, 2, 1, 2], [0], [0]>} : vector<2x8x32xf32>, vector<2x8x64xf32>, vector<2x32x64xf32> -> vector<2x32x64xf32>
    %cst_40 = arith.constant dense<0.000000e+00> : vector<2x32xf32>
    %101 = vector.multi_reduction <add>, %99, %cst_40 [1] : vector<2x8x32xf32> to vector<2x32xf32>
    %102 = vector.shape_cast %101 : vector<2x32xf32> to vector<2x1x32xf32>
    %103 = arith.subf %54, %100 : vector<2x32x64xf32>
    %104 = arith.subf %55, %92 : vector<2x32x32xf32>
    %105 = arith.subf %56, %82 : vector<2x1x32xf32>
    %106 = arith.subf %57, %102 : vector<2x1x32xf32>
    %107 = arith.subf %58, %94 : vector<2x1x32xf32>
    %108 = arith.subf %59, %84 : vector<2x1x1xf32>
    %cst_41 = arith.constant dense<0.000000e+00> : vector<2x8x32xf32>
    %109 = tpu.matmul %1, %103, %cst_41 {dimension_numbers = #tpu.dot_dimension_numbers<[2], [2], [1], [1], [0, 0, 0, 1, 1, 1], [0], [0]>} : vector<2x8x64xf32>, vector<2x32x64xf32>, vector<2x8x32xf32> -> vector<2x8x32xf32>
    %110 = vector.broadcast %106 : vector<2x1x32xf32> to vector<2x8x32xf32>
    %111 = arith.addf %109, %110 : vector<2x8x32xf32>
    %cst_42 = arith.constant 0.000000e+00 : f32
    %112 = vector.broadcast %cst_42 : f32 to vector<2x8x32xf32>
    %113 = arith.maximumf %111, %112 : vector<2x8x32xf32>
    %cst_43 = arith.constant dense<0.000000e+00> : vector<2x8x32xf32>
    %114 = tpu.matmul %113, %104, %cst_43 {dimension_numbers = #tpu.dot_dimension_numbers<[2], [2], [1], [1], [0, 0, 0, 1, 1, 1], [0], [0]>} : vector<2x8x32xf32>, vector<2x32x32xf32>, vector<2x8x32xf32> -> vector<2x8x32xf32>
    %115 = vector.broadcast %107 : vector<2x1x32xf32> to vector<2x8x32xf32>
    %116 = arith.addf %114, %115 : vector<2x8x32xf32>
    %cst_44 = arith.constant 0.000000e+00 : f32
    %117 = vector.broadcast %cst_44 : f32 to vector<2x8x32xf32>
    %118 = arith.maximumf %116, %117 : vector<2x8x32xf32>
    %119 = vector.broadcast %105 : vector<2x1x32xf32> to vector<2x8x32xf32>
    %120 = arith.mulf %118, %119 : vector<2x8x32xf32>
    %cst_45 = arith.constant dense<0.000000e+00> : vector<2x8xf32>
    %121 = vector.multi_reduction <add>, %120, %cst_45 [2] : vector<2x8x32xf32> to vector<2x8xf32>
    %122 = vector.shape_cast %121 : vector<2x8xf32> to vector<2x8x1xf32>
    %123 = vector.broadcast %108 : vector<2x1x1xf32> to vector<2x8x1xf32>
    %124 = arith.addf %122, %123 : vector<2x8x1xf32>
    %125 = arith.subf %124, %2 : vector<2x8x1xf32>
    %cst_46 = arith.constant 2.500000e-03 : f32
    %126 = vector.broadcast %cst_46 : f32 to vector<2x8x1xf32>
    %127 = arith.mulf %126, %125 : vector<2x8x1xf32>
    %128 = vector.broadcast %127 : vector<2x8x1xf32> to vector<2x8x32xf32>
    %129 = arith.mulf %128, %118 : vector<2x8x32xf32>
    %cst_47 = arith.constant dense<0.000000e+00> : vector<2x32xf32>
    %130 = vector.multi_reduction <add>, %129, %cst_47 [1] : vector<2x8x32xf32> to vector<2x32xf32>
    %131 = vector.shape_cast %130 : vector<2x32xf32> to vector<2x1x32xf32>
    %cst_48 = arith.constant dense<0.000000e+00> : vector<2x1xf32>
    %132 = vector.multi_reduction <add>, %127, %cst_48 [1] : vector<2x8x1xf32> to vector<2x1xf32>
    %133 = vector.shape_cast %132 : vector<2x1xf32> to vector<2x1x1xf32>
    %134 = vector.broadcast %127 : vector<2x8x1xf32> to vector<2x8x32xf32>
    %135 = vector.broadcast %105 : vector<2x1x32xf32> to vector<2x8x32xf32>
    %136 = arith.mulf %134, %135 : vector<2x8x32xf32>
    %cst_49 = arith.constant 0.000000e+00 : f32
    %137 = vector.broadcast %cst_49 : f32 to vector<2x8x32xf32>
    %138 = arith.cmpf ogt, %116, %137 : vector<2x8x32xf32>
    %cst_50 = arith.constant 0.000000e+00 : f32
    %139 = vector.broadcast %cst_50 : f32 to vector<2x8x32xf32>
    %140 = arith.select %138, %136, %139 : vector<2x8x32xi1>, vector<2x8x32xf32>
    %cst_51 = arith.constant dense<0.000000e+00> : vector<2x32x32xf32>
    %141 = tpu.matmul %140, %113, %cst_51 {dimension_numbers = #tpu.dot_dimension_numbers<[1], [1], [2], [2], [0, 0, 0, 2, 1, 2], [0], [0]>} : vector<2x8x32xf32>, vector<2x8x32xf32>, vector<2x32x32xf32> -> vector<2x32x32xf32>
    %cst_52 = arith.constant dense<0.000000e+00> : vector<2x32xf32>
    %142 = vector.multi_reduction <add>, %140, %cst_52 [1] : vector<2x8x32xf32> to vector<2x32xf32>
    %143 = vector.shape_cast %142 : vector<2x32xf32> to vector<2x1x32xf32>
    %cst_53 = arith.constant dense<0.000000e+00> : vector<2x8x32xf32>
    %144 = tpu.matmul %140, %104, %cst_53 {dimension_numbers = #tpu.dot_dimension_numbers<[2], [1], [1], [2], [0, 0, 0, 1, 1, 2], [0], [0]>} : vector<2x8x32xf32>, vector<2x32x32xf32>, vector<2x8x32xf32> -> vector<2x8x32xf32>
    %cst_54 = arith.constant 0.000000e+00 : f32
    %145 = vector.broadcast %cst_54 : f32 to vector<2x8x32xf32>
    %146 = arith.cmpf ogt, %111, %145 : vector<2x8x32xf32>
    %cst_55 = arith.constant 0.000000e+00 : f32
    %147 = vector.broadcast %cst_55 : f32 to vector<2x8x32xf32>
    %148 = arith.select %146, %144, %147 : vector<2x8x32xi1>, vector<2x8x32xf32>
    %cst_56 = arith.constant dense<0.000000e+00> : vector<2x32x64xf32>
    %149 = tpu.matmul %148, %1, %cst_56 {dimension_numbers = #tpu.dot_dimension_numbers<[1], [1], [2], [2], [0, 0, 0, 2, 1, 2], [0], [0]>} : vector<2x8x32xf32>, vector<2x8x64xf32>, vector<2x32x64xf32> -> vector<2x32x64xf32>
    %cst_57 = arith.constant dense<0.000000e+00> : vector<2x32xf32>
    %150 = vector.multi_reduction <add>, %148, %cst_57 [1] : vector<2x8x32xf32> to vector<2x32xf32>
    %151 = vector.shape_cast %150 : vector<2x32xf32> to vector<2x1x32xf32>
    %152 = arith.subf %103, %149 : vector<2x32x64xf32>
    %153 = arith.subf %104, %141 : vector<2x32x32xf32>
    %154 = arith.subf %105, %131 : vector<2x1x32xf32>
    %155 = arith.subf %106, %151 : vector<2x1x32xf32>
    %156 = arith.subf %107, %143 : vector<2x1x32xf32>
    %157 = arith.subf %108, %133 : vector<2x1x1xf32>
    %cst_58 = arith.constant 0.000000e+00 : f32
    %158 = vector.broadcast %cst_58 : f32 to vector<2x32x32xf32>
    %159 = tpu.concatenate %152, %153, %158 in 2 : vector<2x32x64xf32>, vector<2x32x32xf32>, vector<2x32x32xf32> -> vector<2x32x128xf32>
    %c0_59 = arith.constant 0 : index
    %c0_60 = arith.constant 0 : index
    %c0_61 = arith.constant 0 : index
    %160 = vector.load %arg4[%c0_59, %c0_60, %c0_61] : memref<2x32x128xf32, #tpu.memory_space<vmem>>, vector<2x32x128xf32>
    tpu.vector_store %arg4[%c0_59, %c0_60, %c0_61], %159 {strides = array<i32>} : memref<2x32x128xf32, #tpu.memory_space<vmem>>, vector<2x32x128xf32>,
    %cst_62 = arith.constant 0.000000e+00 : f32
    %161 = vector.broadcast %cst_62 : f32 to vector<2x1x31xf32>
    %162 = tpu.concatenate %155, %156, %154, %157, %161 in 2 : vector<2x1x32xf32>, vector<2x1x32xf32>, vector<2x1x32xf32>, vector<2x1x1xf32>, vector<2x1x31xf32> -> vector<2x1x128xf32>
    %c0_63 = arith.constant 0 : index
    %c0_64 = arith.constant 0 : index
    %c0_65 = arith.constant 0 : index
    %163 = vector.load %arg5[%c0_63, %c0_64, %c0_65] : memref<2x1x128xf32, #tpu.memory_space<vmem>>, vector<2x1x128xf32>
    tpu.vector_store %arg5[%c0_63, %c0_64, %c0_65], %162 {strides = array<i32>} : memref<2x1x128xf32, #tpu.memory_space<vmem>>, vector<2x1x128xf32>,
    return
  }
  func.func @transform_0(%arg0: i32) -> (i32, i32, i32) {
    %c0_i32 = arith.constant 0 : i32
    %c0_i32_0 = arith.constant 0 : i32
    %c0_i32_1 = arith.constant 0 : i32
    return %arg0, %c0_i32, %c0_i32_0 : i32, i32, i32
  }
  func.func @transform_1(%arg0: i32) -> (i32, i32, i32) {
    %c0_i32 = arith.constant 0 : i32
    %c0_i32_0 = arith.constant 0 : i32
    %c0_i32_1 = arith.constant 0 : i32
    return %arg0, %c0_i32, %c0_i32_0 : i32, i32, i32
  }
  func.func @transform_2(%arg0: i32) -> (i32, i32, i32) {
    %c0_i32 = arith.constant 0 : i32
    %c0_i32_0 = arith.constant 0 : i32
    %c0_i32_1 = arith.constant 0 : i32
    return %arg0, %c0_i32, %c0_i32_0 : i32, i32, i32
  }
  func.func @transform_3(%arg0: i32) -> (i32, i32, i32) {
    %c0_i32 = arith.constant 0 : i32
    %c0_i32_0 = arith.constant 0 : i32
    %c0_i32_1 = arith.constant 0 : i32
    return %arg0, %c0_i32, %c0_i32_0 : i32, i32, i32
  }
  func.func @transform_4(%arg0: i32) -> (i32, i32, i32) {
    %c0_i32 = arith.constant 0 : i32
    %c0_i32_0 = arith.constant 0 : i32
    %c0_i32_1 = arith.constant 0 : i32
    return %arg0, %c0_i32, %c0_i32_0 : i32, i32, i32
  }
}

</mosaic_0001>

<bundles_post_ra>
// kernel: hml_forward.1
= control target key start
LH: loop header
LB: loop body
LE: loop exit
PB: predicated region body
PF: predicated region fallthrough
CT: control target
= control target key end

     0   :  { %s2716_s15 = smov 0   ;;  %s3492_s0 = inlined_call_operand.vmem [shape: f32[4,8,128], index: 0, kind: input, shape index: {}]   ;;  %s3493_s1 = inlined_call_operand.vmem [shape: f32[4,32,128], index: 1, kind: input, shape index: {}, may-alias: {1,3}]   ;;  %s3494_s2 = inlined_call_operand.vmem [shape: f32[4,1,128], index: 2, kind: input, shape index: {}, may-alias: {2,4}]   ;;  %s3495_s3 = inlined_call_operand.vmem [shape: f32[4,32,128], index: 3, kind: output, shape index: {0}, may-alias: {1,3}]   ;;  %s3496_s4 = inlined_call_operand.vmem [shape: f32[4,1,128], index: 4, kind: output, shape index: {1}, may-alias: {2,4}]  }
   0x1 LB: > { %s2524_s16 = sadd.s32 4294967295, %s2685_s15   ;;  %p2528_p0 = scmp.ge.s32.totalorder %s2685_s15, 1  ;;  %s2685_s15 = sphi %s2716_s15, %s15_s15  }
   0x2   : > { %p188_p1 = scmp.lt.s32.totalorder %s2685_s15, 3 }
   0x4   : > { %p189_p2 = pnand %p2528_p0, %p188_p1 }
   0x5   : > { %s2529_s17 = sshll.u32 (!%p189_p2), %s2524_s16, 1  ;;  %s2687_s22 = smov (!%p189_p2), 64  }
   0x6   : > { %192 = sbr.rel (%p189_p2) target bundleno = 3593 (0xe09), region = 32  ;;  %p230_p3 = scmp.lt.s32.totalorder (!%p189_p2), %s2529_s17, 3 }
   0x7   : > { %s2688_s30 = smov (!%p189_p2), 96   ;;  %s2689_s5 = smov (!%p189_p2), 32  }
   0xb   : > { %s3498_s17 = smov (!%p230_p3, %s2529_s17), 3  ;;  %vm277_vm0 = vcmask 523264   ;;  %vm361_vm1 = vcmask 261120   ;;  %v2690_v40 = vmov 96   ;;  %vm550_vm4 = vcmask 64512  }
   0xc   : > { %s2655_s18 = sshll.u32 %s3498_s17, 5  ;;  %s2530_s23 = sshll.u32 %s3498_s17, 3  ;;  %2672 = vset.pattern.permute.xlu2 %v2690_v40  ;;  %vm489_vm7 = vcmask 794368  }
   0xd   : > { %s240_s21 = scalar_lea.vmem %s3493_s1, %s2655_s18  ;;  %s2772_s26 = scalar_lea.vmem %s3492_s0, %s2530_s23 }
   0xe   : > { %v2732_v0 = vld [vmem:[%s240_s21 + $0x18] sm:$0xff]  ;;  %v2740_v2 = vld [vmem:[%s240_s21 + $0x10] sm:$0xff]  ;;  %v2746_v4 = vld [vmem:[%s240_s21 + $0x8] sm:$0xff]  ;;  %s2800_s29 = scalar_lea.vmem %s3494_s2, %s3498_s17  ;;  %s257_s8 = scalar_lea.vmem %s3496_s4, %s3498_s17 }
   0xf   : > { %v2734_v1 = vld [vmem:[%s240_s21 + $0x38] sm:$0xff]  ;;  %2539 = vmatpush.xpose.msk.msra.mxu0 %vm277_vm0, %v2732_v0  ;;  %v2742_v3 = vld [vmem:[%s240_s21 + $0x30] sm:$0xff]  ;;  %356 = vrot.lane.b32.xlu0 %v2732_v0, %s2687_s22  ;;  %v2756_v5 = vld [vmem:[%s240_s21 + $0x28] sm:$0xff]  ;;  %s3449_s11 = scalar_lea.vmem %s3495_s3, %s2655_s18 }
  0x10   : > { %2544 = vmatpush.xpose.msk.msra.mxu1 %vm277_vm0, %v2734_v1  ;;  %354 = vrot.lane.b32.xlu1 %v2740_v2, %s2687_s22  ;;  %v2763_v6 = vld [vmem:[%s240_s21] sm:$0xff]  ;;  %v2786_v9 = vld [vmem:[%s2772_s26 + $0x8] sm:$0xff] }
  0x11   : > { %352 = vrot.lane.b32.xlu2 %v2746_v4, %s2687_s22  ;;  %v2765_v7 = vld [vmem:[%s240_s21 + $0x20] sm:$0xff] }
  0x12   : > { %v2783_v8 = vld [vmem:[%s2772_s26] sm:$0xff] }
  0x13   : > { %2540 = vmatpush.xpose.msk.msra.mxu0 %vm277_vm0, %v2740_v2  ;;  %v2803_v10 = vld [vmem:[%s2800_s29] ss:$0 sm:$0xff]  ;;  %v2810_v11 = vld [vmem:[%s2800_s29 + $0x1] ss:$0 sm:$0xff] }
  0x14   : > { %2545 = vmatpush.xpose.msk.msra.mxu1 %vm277_vm0, %v2742_v3 }
  0x17   : > { %2541 = vmatpush.xpose.msk.msra.mxu0 %vm277_vm0, %v2746_v4  ;;  %399 = vrot.lane.b32.xlu0 %v2734_v1, %s2687_s22 }
  0x18   : > { %2546 = vmatpush.xpose.msk.msra.mxu1 %vm277_vm0, %v2756_v5  ;;  %397 = vrot.lane.b32.xlu1 %v2742_v3, %s2687_s22 }
  0x19   : > { %395 = vrot.lane.b32.xlu2 %v2756_v5, %s2687_s22 }
  0x1b   : > { %2542 = vmatpush.xpose.msk.msra.mxu0 %vm277_vm0, %v2763_v6 }
  0x1c   : > { %2547 = vmatpush.xpose.msk.msra.mxu1 %vm277_vm0, %v2765_v7 }
  0x1e   : > { %2543 = vmatmul.msk.f32.vlgmr.msra.gmra.mxu0 %vm277_vm0, %v2783_v8 }
  0x1f   : > { %2548 = vmatmul.msk.f32.vlgmr.msra.gmra.mxu1 %vm277_vm0, %v2786_v9  ;;  %350 = vrot.lane.b32.xlu0 %v2763_v6, %s2687_s22 }
  0x20   : > { %393 = vrot.lane.b32.xlu1 %v2765_v7, %s2687_s22 }
  0x21   : > { %358 = vrot.lane.b32.xlu2 %v2803_v10, %s2688_s30 }
  0x27   : > { %401 = vrot.lane.b32.xlu0 %v2810_v11, %s2688_s30 }
  0x28   : > { %437 = vrot.lane.b32.xlu1 %v2803_v10, %s2687_s22 }
  0x29   : > { %439 = vrot.lane.b32.xlu2 %v2810_v11, %s2687_s22 }
  0x31   : > { %453 = vrot.lane.b32.xlu2 %v2783_v8, %s2689_s5 }
  0x39   : > { %455 = vrot.lane.b32.xlu2 %v2786_v9, %s2689_s5 }
  0x6b   : > { %v353_v14 = vpop.permute.xlu2 %352 }
  0x73   : > { %v396_v17 = vpop.permute.xlu2 %395 }
  0x7b   : > { %v359_v26 = vpop.permute.xlu2 %358 }
  0x81   : > { %v357_v12 = vpop.permute.xlu0 %356 }
  0x82   : > { %v355_v13 = vpop.permute.xlu1 %354  ;;  %2549 = vmatpush.xpose.msk.msra.mxu2 %vm361_vm1, %v357_v12 }
  0x83   : > { %v440_v34 = vpop.permute.xlu2 %439 }
  0x86   : > { %2550 = vmatpush.xpose.msk.msra.mxu2 %vm361_vm1, %v355_v13 }
  0x89   : > { %v400_v15 = vpop.permute.xlu0 %399 }
  0x8a   : > { %v398_v16 = vpop.permute.xlu1 %397  ;;  %2554 = vmatpush.xpose.msk.msra.mxu3 %vm361_vm1, %v400_v15  ;;  %2551 = vmatpush.xpose.msk.msra.mxu2 %vm361_vm1, %v353_v14 }
  0x8b   : > { %v2851_v41 = vpop.permute.xlu2 %453 }
  0x8e   : > { %2555 = vmatpush.xpose.msk.msra.mxu3 %vm361_vm1, %v398_v16 }
  0x91   : > { %v351_v18 = vpop.permute.xlu0 %350 }
  0x92   : > { %2556 = vmatpush.xpose.msk.msra.mxu3 %vm361_vm1, %v396_v17  ;;  %2552 = vmatpush.xpose.msk.msra.mxu2 %vm361_vm1, %v351_v18  ;;  %v394_v19 = vpop.permute.xlu1 %393 }
  0x93   : > { %v2858_v48 = vpop.permute.xlu2 %455 }
  0x96   : > { %2557 = vmatpush.xpose.msk.msra.mxu3 %vm361_vm1, %v394_v19 }
  0x99   : > { %v402_v28 = vpop.permute.xlu0 %401 }
  0x9a   : > { %v438_v31 = vpop.permute.xlu1 %437 }
  0x9b   : > { %v310_v20 = vpop.f32.mrf.mxu0 }
  0x9c   : > { %v345_v21 = vpop.f32.mrf.mxu1  ;;  %v2825_v22 = vadd.f32 %v2803_v10, %v310_v20 }
  0x9d   : > { %v2828_v23 = vadd.f32 %v2810_v11, %v345_v21 }
  0x9e   : > { %v348_v24 = vmax.f32 %v2825_v22, 0.0  ;;  %vm733_vm5 = vcmp.gt.f32.partialorder %v2825_v22, 0.0 }
  0x9f   : > { %v349_v25 = vmax.f32 %v2828_v23, 0.0  ;;  %vm734_vm6 = vcmp.gt.f32.partialorder %v2828_v23, 0.0 }
  0xa0   : > { %2553 = vmatmul.msk.f32.vlgmr.msra.gmra.mxu2 %vm361_vm1, %v348_v24  ;;  %578 = vmatpush.msrb.mxu0 %v348_v24 }
  0xa1   : > { %2657 = vmatpush.msrb.mxu2 %v348_v24  ;;  %2658 = vmatpush.msrb.mxu3 %v349_v25 }
  0xa2   : > { %2558 = vmatmul.msk.f32.vlgmr.msra.gmra.mxu3 %vm361_vm1, %v349_v25  ;;  %651 = vmatpush.msrb.mxu1 %v349_v25 }
  0xa3   : > { %698 = vmatpush.msra.mxu2 %v357_v12  ;;  %725 = vmatpush.msra.mxu3 %v400_v15 }
  0xa5   : > { %699 = vmatpush.msra.mxu2 %v355_v13  ;;  %726 = vmatpush.msra.mxu3 %v398_v16 }
  0xa7   : > { %700 = vmatpush.msra.mxu2 %v353_v14  ;;  %727 = vmatpush.msra.mxu3 %v396_v17 }
  0xa9   : > { %701 = vmatpush.msra.mxu2 %v351_v18  ;;  %728 = vmatpush.msra.mxu3 %v394_v19 }
 0x123   : > { %v390_v27 = vpop.f32.mrf.mxu2 }
 0x124   : > { %v2838_v29 = vadd.f32 %v390_v27, %v359_v26 }
 0x125   : > { %v432_v30 = vpop.f32.mrf.mxu3 }
 0x126   : > { %v2840_v32 = vadd.f32 %v432_v30, %v402_v28  ;;  %v435_v33 = vmax.f32 %v2838_v29, 0.0  ;;  %vm506_vm2 = vcmp.gt.f32.partialorder %v2838_v29, 0.0 }
 0x128   : > { %v443_v35 = vmul.f32 %v438_v31, %v435_v33  ;;  %v436_v36 = vmax.f32 %v2840_v32, 0.0  ;;  %vm507_vm3 = vcmp.gt.f32.partialorder %v2840_v32, 0.0 }
 0x12a   : > { %v444_v37 = vmul.f32 %v440_v34, %v436_v36  ;;  %v445_v38 = vsel %vm361_vm1, %v443_v35, 0.0 }
 0x12b   : > { %446 = vadd.xlane.f32.xlu0 %v445_v38 }
 0x12c   : > { %v448_v39 = vsel %vm361_vm1, %v444_v37, 0.0 }
 0x12d   : > { %449 = vadd.xlane.f32.xlu1 %v448_v39 }
 0x19e   : > { %v447_v42 = vpop.xlane.xlu0 %446 }
 0x19f   : > { %v451_v43 = vadd.f32 %v2803_v10, %v447_v42 }
 0x1a0   : > { %v450_v44 = vpop.xlane.xlu1 %449 }
 0x1a1   : > { %v459_v45 = vsub.f32 %v451_v43, %v2851_v41  ;;  %v452_v47 = vadd.f32 %v2810_v11, %v450_v44 }
 0x1a3   : > { %v2855_v46 = vmul.f32 0.0025, %v459_v45  ;;  %v460_v49 = vsub.f32 %v452_v47, %v2858_v48 }
 0x1a5   : > { %465 = vperm.xlu2 %2672, %v2855_v46   ;;  %v2862_v50 = vmul.f32 0.0025, %v460_v49 }
 0x1ad   : > { %470 = vperm.xlu2 %2672, %v2862_v50  }
 0x1ff   : > { %v2865_v51 = vpop.permute.xlu2 %465 }
 0x200   : > { %v504_v52 = vmul.f32 %v2803_v10, %v2865_v51 }
 0x202   : > { %510 = vrot.lane.b32.xlu2 %v504_v52, %s2687_s22 }
 0x207   : > { %v471_v53 = vpop.permute.xlu2 %470 }
 0x208   : > { %v505_v54 = vmul.f32 %v2810_v11, %v471_v53  ;;  %v474_v31 = vmul.f32 %v471_v53, %v436_v36 }
 0x20a   : > { %512 = vrot.lane.b32.xlu2 %v505_v54, %s2687_s22  ;;  %v482_v35 = vsel %vm361_vm1, %v474_v31, 0.0 }
 0x20b   : > { %v483_v38 = vrot.slane %v482_v35, 4 }
 0x20d   : > { %v484_v43 = vadd.f32 %v483_v38, %v482_v35 }
 0x20f   : > { %v485_v32 = vrot.slane %v484_v43, 2 }
 0x211   : > { %v486_v52 = vadd.f32 %v485_v32, %v484_v43  ;;  %v2984_v43 = vld [vmem:[%s2800_s29 + $0x1] sm:$0x1] }
 0x213   : > { %v487_v53 = vrot.slane %v486_v52, 1 }
 0x25c   : > { %v511_v55 = vpop.permute.xlu2 %510 }
 0x25d   : > { %v516_v56 = vsel %vm506_vm2, %v511_v55, 0.0  ;;  %v488_v55 = vadd.f32 %v487_v53, %v486_v52  ;;  %vm2389_vm2 = vcmask 785408  }
 0x25e   : > { %518 = vxpose.xlu0.b32.start.end [1/1] (short) (narrow) %v516_v56, 32  ;;  %v665_v28 = vsel %vm361_vm1, %v516_v56, 0.0 }
 0x25f   : > { %v666_v30 = vrot.slane %v665_v28, 4 }
 0x261   : > { %v667_v34 = vadd.f32 %v666_v30, %v665_v28  ;;  %v473_v28 = vmul.f32 %v2865_v51, %v435_v33 }
 0x263   : > { %v668_v39 = vrot.slane %v667_v34, 2 }
 0x264   : > { %v513_v57 = vpop.permute.xlu2 %512 }
 0x265   : > { %v2874_v58 = vsel %vm507_vm3, %v513_v57, 0.0  ;;  %v669_v44 = vadd.f32 %v668_v39, %v667_v34  ;;  %v475_v34 = vsel %vm361_vm1, %v473_v28, 0.0  ;;  %vm2412_vm3 = vcmask 793600  }
 0x266   : > { %592 = vxpose.xlu1.b32.start.end [1/1] (short) (narrow) %v2874_v58, 32  ;;  %v476_v35 = vrot.slane %v475_v34, 4 }
 0x267   : > { %v670_v36 = vrot.slane %v669_v44, 1 }
 0x268   : > { %v477_v38 = vadd.f32 %v476_v35, %v475_v34 }
 0x269   : > { %v671_v49 = vadd.f32 %v670_v36, %v669_v44 }
 0x2b9   : > { %2673 = vset.pattern.permute.xlu1 %v2690_v40 }
 0x302   : > { %v534_v59 = vpop.trf.xlu0 }
 0x303   : > { %2559 = vmatmul.msk.f32.vlgmr.msrb.gmra.mxu0 %vm550_vm4, %v534_v59 }
 0x30a   : > { %v535_v60 = vpop.trf.xlu0  ;;  %v608_v61 = vpop.trf.xlu1 }
 0x30b   : > { %2563 = vmatmul.msk.f32.vlgmr.msrb.gmra.mxu1 %vm550_vm4, %v608_v61  ;;  %2560 = vmatmul.msk.f32.gmra.mxu0 %vm550_vm4, %v535_v60 }
 0x312   : > { %v536_v62 = vpop.trf.xlu0  ;;  %v609_v63 = vpop.trf.xlu1 }
 0x313   : > { %2564 = vmatmul.msk.f32.gmra.mxu1 %vm550_vm4, %v609_v63  ;;  %2561 = vmatmul.msk.f32.gmra.mxu0 %vm550_vm4, %v536_v62 }
 0x31a   : > { %v537_v10 = vpop.trf.xlu0  ;;  %v610_v11 = vpop.trf.xlu1 }
 0x31b   : > { %2562 = vmatmul.msk.f32.vlgmr.msrb.gmra.mxu2 %vm550_vm4, %v537_v10  ;;  %2565 = vmatmul.msk.f32.gmra.mxu1 %vm550_vm4, %v610_v11  ;;  %v672_v10 = vsel %vm361_vm1, %v2874_v58, 0.0 }
 0x31c   : > { %796 = vmatpush.msrb.mxu2 %v2783_v8 }
 0x322   : > { %v611_v12 = vpop.trf.xlu1 }
 0x323   : > { %2566 = vmatmul.msk.f32.vlgmr.msrb.gmra.mxu3 %vm550_vm4, %v611_v12  ;;  %2567 = vmatmul.msk.f32.vlgmr.msra.gmra.mxu2 %vm361_vm1, %v516_v56  ;;  %v673_v12 = vrot.slane %v672_v10, 4 }
 0x324   : > { %869 = vmatpush.msrb.mxu3 %v2786_v9 }
 0x32b   : > { %2568 = vmatmul.msk.f32.vlgmr.msra.gmra.mxu3 %vm361_vm1, %v2874_v58 }
 0x380   : > { %v580_v25 = vpop.f32.mrf.mxu0 }
 0x388   : > { %v653_v13 = vpop.f32.mrf.mxu1  ;;  %v583_v27 = vpop.f32.mrf.mxu0 }
 0x390   : > { %v656_v15 = vpop.f32.mrf.mxu1  ;;  %v586_v37 = vpop.f32.mrf.mxu0 }
 0x398   : > { %v659_v19 = vpop.f32.mrf.mxu1 }
 0x39e   : > { %v589_v14 = vpop.f32.mrf.mxu2 }
 0x3a6   : > { %v662_v16 = vpop.f32.mrf.mxu3  ;;  %v703_v17 = vpop.f32.mrf.mxu2 }
 0x3a7   : > { %v2892_v18 = vsel %vm733_vm5, %v703_v17, 0.0  ;;  %927 = vrot.lane.b32.xlu1 %v662_v16, %s2687_s22 }
 0x3a8   : > { %737 = vxpose.xlu2.b32.start.end [1/1] (short) (narrow) %v2892_v18, 32 }
 0x3ae   : > { %v730_v20 = vpop.f32.mrf.mxu3 }
 0x3af   : > { %925 = vrot.lane.b32.xlu1 %v659_v19, %s2687_s22  ;;  %v2898_v21 = vsel %vm734_vm6, %v730_v20, 0.0 }
 0x3b0   : > { %810 = vxpose.xlu0.b32.start.end [1/1] (short) (narrow) %v2898_v21, 32 }
 0x3b7   : > { %923 = vrot.lane.b32.xlu1 %v656_v15, %s2687_s22 }
 0x3bf   : > { %921 = vrot.lane.b32.xlu1 %v653_v13, %s2687_s22 }
 0x419   : > { %v928_v22 = vpop.permute.xlu1 %927 }
 0x41a   : > { %v2904_v24 = vsub.f32 %v2734_v1, %v928_v22 }
 0x41c   : > { %1101 = vrot.lane.b32.xlu1 %v2904_v24, %s2687_s22 }
 0x421   : > { %v926_v26 = vpop.permute.xlu1 %925 }
 0x422   : > { %v2909_v23 = vsub.f32 %v2742_v3, %v926_v26 }
 0x424   : > { %1099 = vrot.lane.b32.xlu1 %v2909_v23, %s2687_s22 }
 0x429   : > { %919 = vrot.lane.b32.xlu2 %v589_v14, %s2687_s22  ;;  %v924_v42 = vpop.permute.xlu1 %923  ;;  %v674_v14 = vadd.f32 %v673_v12, %v672_v10 }
 0x42a   : > { %v2922_v45 = vsub.f32 %v2756_v5, %v924_v42  ;;  %v478_v42 = vrot.slane %v477_v38, 2 }
 0x42b   : > { %v675_v16 = vrot.slane %v674_v14, 2 }
 0x42d   : > { %v676_v19 = vadd.f32 %v675_v16, %v674_v14 }
 0x42f   : > { %v677_v58 = vrot.slane %v676_v19, 1 }
 0x431   : > { %915 = vrot.lane.b32.xlu2 %v583_v27, %s2687_s22  ;;  %v922_v11 = vpop.permute.xlu1 %921 }
 0x432   : > { %v2987_v32 = vsub.f32 %v2765_v7, %v922_v11 }
 0x436   : > { %917 = vrot.lane.b32.xlu0 %v586_v37, %s2687_s22  ;;  %v2971_v37 = vld [vmem:[%s2800_s29] sm:$0x1] }
 0x439   : > { %913 = vrot.lane.b32.xlu2 %v580_v25, %s2687_s22  ;;  %v678_v25 = vadd.f32 %v677_v58, %v676_v19 }
 0x43e   : > { %1097 = vrot.lane.b32.xlu0 %v2922_v45, %s2687_s22 }
 0x441   : > { %v753_v47 = vpop.trf.xlu2 }
 0x442   : > { %2569 = vmatmul.msk.f32.vlgmr.msrb.gmra.mxu2 %vm550_vm4, %v753_v47  ;;  %v479_v47 = vadd.f32 %v478_v42, %v477_v38 }
 0x444   : > { %v480_v53 = vrot.slane %v479_v47, 1 }
 0x446   : > { %959 = vrot.lane.b32.xlu0 %v671_v49, %s2689_s5 }
 0x449   : > { %v754_v54 = vpop.trf.xlu2 }
 0x44a   : > { %2570 = vmatmul.msk.f32.gmra.mxu2 %vm550_vm4, %v754_v54  ;;  %v481_v54 = vadd.f32 %v480_v53, %v479_v47 }
 0x44e   : > { %949 = vrot.lane.b32.xlu0 %v488_v55, %s2687_s22 }
 0x451   : > { %v755_v56 = vpop.trf.xlu2 }
 0x452   : > { %2571 = vmatmul.msk.f32.gmra.mxu2 %vm550_vm4, %v755_v56 }
 0x454   : > { %v826_v57 = vpop.trf.xlu0 }
 0x455   : > { %2573 = vmatmul.msk.f32.vlgmr.msrb.gmra.mxu3 %vm550_vm4, %v826_v57 }
 0x459   : > { %v756_v59 = vpop.trf.xlu2 }
 0x45a   : > { %2572 = vmatmul.msk.f32.gmra.mxu2 %vm550_vm4, %v756_v59 }
 0x45c   : > { %v827_v60 = vpop.trf.xlu0 }
 0x45d   : > { %2574 = vmatmul.msk.f32.gmra.mxu3 %vm550_vm4, %v827_v60 }
 0x464   : > { %v828_v61 = vpop.trf.xlu0 }
 0x465   : > { %2575 = vmatmul.msk.f32.gmra.mxu3 %vm550_vm4, %v828_v61 }
 0x46c   : > { %v829_v62 = vpop.trf.xlu0 }
 0x46d   : > { %2576 = vmatmul.msk.f32.gmra.mxu3 %vm550_vm4, %v829_v62 }
 0x483   : > { %v920_v63 = vpop.permute.xlu2 %919 }
 0x484   : > { %v2963_v31 = vsub.f32 %v2732_v0, %v920_v63 }
 0x48b   : > { %v916_v13 = vpop.permute.xlu2 %915 }
 0x48c   : > { %v2974_v33 = vsub.f32 %v2746_v4, %v916_v13 }
 0x48e   : > { %v2938_v15 = vpop.permute.xlu1 %1101 }
 0x48f   : > { %2592 = vmatpush.xpose.msk.msra.mxu3 %vm361_vm1, %v2938_v15 }
 0x493   : > { %v914_v17 = vpop.permute.xlu2 %913 }
 0x494   : > { %v2943_v20 = vsub.f32 %v2763_v6, %v914_v17 }
 0x496   : > { %v2945_v22 = vpop.permute.xlu1 %1099  ;;  %1049 = vrot.lane.b32.xlu1 %v2943_v20, %s2687_s22 }
 0x497   : > { %2593 = vmatpush.xpose.msk.msra.mxu3 %vm361_vm1, %v2945_v22 }
 0x49e   : > { %961 = vrot.lane.b32.xlu1 %v678_v25, %s2689_s5 }
 0x4a8   : > { %v918_v26 = vpop.permute.xlu0 %917 }
 0x4a9   : > { %v2953_v27 = vsub.f32 %v2740_v2, %v918_v26  ;;  %v883_v26 = vsel %vm361_vm1, %v2892_v18, 0.0 }
 0x4ab   : > { %1053 = vrot.lane.b32.xlu2 %v2953_v27, %s2687_s22 }
 0x4b0   : > { %v2960_v30 = vpop.permute.xlu0 %1097 }
 0x4b1   : > { %2594 = vmatpush.xpose.msk.msra.mxu3 %vm361_vm1, %v2960_v30 }
 0x4b3   : > { %1055 = vrot.lane.b32.xlu2 %v2963_v31, %s2687_s22 }
 0x4b8   : > { %v960_v29 = vpop.permute.xlu0 %959 }
 0x4b9   : > { %v2977_v51 = vsub.f32 %v2971_v37, %v960_v29 }
 0x4bb   : > { %v1043_v39 = vperm.slane %v2977_v51, 0  ;;  %1051 = vrot.lane.b32.xlu2 %v2974_v33, %s2687_s22 }
 0x4bd   : > { %1057 = vrot.lane.b32.xlu1 %v1043_v39, %s2688_s30 }
 0x4c0   : > { %v950_v44 = vpop.permute.xlu0 %949 }
 0x4c1   : > { %v2990_v36 = vsub.f32 %v2984_v43, %v950_v44 }
 0x4c3   : > { %v1142_v49 = vperm.slane %v2990_v36, 0  ;;  %1095 = vrot.lane.b32.xlu2 %v2987_v32, %s2687_s22 }
 0x4c5   : > { %v798_v52 = vpop.f32.mrf.mxu2  ;;  %1147 = vrot.lane.b32.xlu1 %v1142_v49, %s2687_s22 }
 0x4cb   : > { %947 = vrot.lane.b32.xlu2 %v481_v54, %s2687_s22 }
 0x4cd   : > { %v801_v55 = vpop.f32.mrf.mxu2 }
 0x4ce   : > { %v3010_v63 = vsub.f32 %v2746_v4, %v801_v55 }
 0x4d5   : > { %v804_v56 = vpop.f32.mrf.mxu2 }
 0x4d6   : > { %v3003_v61 = vsub.f32 %v2740_v2, %v804_v56 }
 0x4d8   : > { %v871_v57 = vpop.f32.mrf.mxu3 }
 0x4d9   : > { %v3037_v12 = vsub.f32 %v2765_v7, %v871_v57 }
 0x4dd   : > { %v807_v59 = vpop.f32.mrf.mxu2 }
 0x4de   : > { %v3000_v60 = vsub.f32 %v2732_v0, %v807_v59  ;;  %v3015_v0 = vsub.f32 %v2763_v6, %v798_v52 }
 0x4e0   : > { %v874_v62 = vpop.f32.mrf.mxu3  ;;  %2577 = vmatpush.xpose.msk.msra.mxu0 %vm277_vm0, %v3000_v60 }
 0x4e1   : > { %v3032_v6 = vsub.f32 %v2756_v5, %v874_v62 }
 0x4e4   : > { %2578 = vmatpush.xpose.msk.msra.mxu0 %vm277_vm0, %v3003_v61 }
 0x4e8   : > { %v877_v10 = vpop.f32.mrf.mxu3  ;;  %2579 = vmatpush.xpose.msk.msra.mxu0 %vm277_vm0, %v3010_v63 }
 0x4e9   : > { %v3027_v4 = vsub.f32 %v2742_v3, %v877_v10 }
 0x4ec   : > { %2580 = vmatpush.xpose.msk.msra.mxu0 %vm277_vm0, %v3015_v0 }
 0x4ef   : > { %2581 = vmatmul.msk.f32.vlgmr.msra.gmra.mxu0 %vm277_vm0, %v2783_v8 }
 0x4f0   : > { %v880_v2 = vpop.f32.mrf.mxu3 }
 0x4f1   : > { %v3022_v11 = vsub.f32 %v2734_v1, %v880_v2 }
 0x4f3   : > { %2582 = vmatpush.xpose.msk.msra.mxu1 %vm277_vm0, %v3022_v11 }
 0x4f7   : > { %2583 = vmatpush.xpose.msk.msra.mxu1 %vm277_vm0, %v3027_v4 }
 0x4fb   : > { %2584 = vmatpush.xpose.msk.msra.mxu1 %vm277_vm0, %v3032_v6 }
 0x4ff   : > { %2585 = vmatpush.xpose.msk.msra.mxu1 %vm277_vm0, %v3037_v12 }
 0x502   : > { %2586 = vmatmul.msk.f32.vlgmr.msra.gmra.mxu1 %vm277_vm0, %v2786_v9 }
 0x505   : > { %v1054_v1 = vpop.permute.xlu2 %1053 }
 0x508   : > { %v1050_v3 = vpop.permute.xlu1 %1049 }
 0x50d   : > { %v1056_v13 = vpop.permute.xlu2 %1055 }
 0x50e   : > { %2587 = vmatpush.xpose.msk.msra.mxu2 %vm361_vm1, %v1056_v13 }
 0x510   : > { %v962_v14 = vpop.permute.xlu1 %961 }
 0x511   : > { %v3045_v5 = vsub.f32 %v2984_v43, %v962_v14 }
 0x512   : > { %2588 = vmatpush.xpose.msk.msra.mxu2 %vm361_vm1, %v1054_v1 }
 0x513   : > { %v1044_v7 = vperm.slane %v3045_v5, 0 }
 0x515   : > { %1103 = vrot.lane.b32.xlu2 %v1044_v7, %s2688_s30  ;;  %v1052_v16 = vpop.permute.xlu2 %1051 }
 0x516   : > { %2589 = vmatpush.xpose.msk.msra.mxu2 %vm361_vm1, %v1052_v16 }
 0x51a   : > { %2590 = vmatpush.xpose.msk.msra.mxu2 %vm361_vm1, %v1050_v3 }
 0x51d   : > { %v1096_v17 = vpop.permute.xlu2 %1095 }
 0x51e   : > { %1404 = vmatpush.msrb.mxu2 %v1056_v13  ;;  %2595 = vmatpush.xpose.msk.msra.mxu3 %vm361_vm1, %v1096_v17 }
 0x520   : > { %1405 = vmatpush.msrb.mxu2 %v1054_v1 }
 0x522   : > { %1406 = vmatpush.msrb.mxu2 %v1052_v16  ;;  %1431 = vmatpush.msrb.mxu3 %v2938_v15  ;;  %v884_v15 = vrot.slane %v883_v26, 4 }
 0x524   : > { %1407 = vmatpush.msrb.mxu2 %v1050_v3  ;;  %1432 = vmatpush.msrb.mxu3 %v2945_v22  ;;  %v885_v28 = vadd.f32 %v884_v15, %v883_v26 }
 0x525   : > { %v948_v19 = vpop.permute.xlu2 %947 }
 0x526   : > { %1433 = vmatpush.msrb.mxu3 %v2960_v30  ;;  %v3057_v58 = vsub.f32 %v2971_v37, %v948_v19  ;;  %v886_v34 = vrot.slane %v885_v28, 2  ;;  %v890_v30 = vsel %vm361_vm1, %v2898_v21, 0.0 }
 0x527   : > { %v891_v29 = vrot.slane %v890_v30, 4 }
 0x528   : > { %1434 = vmatpush.msrb.mxu3 %v1096_v17  ;;  %v1141_v25 = vperm.slane %v3057_v58, 0  ;;  %v887_v22 = vadd.f32 %v886_v34, %v885_v28 }
 0x529   : > { %v892_v39 = vadd.f32 %v891_v29, %v890_v30 }
 0x52a   : > { %1145 = vrot.lane.b32.xlu0 %v1141_v25, %s2687_s22  ;;  %v888_v35 = vrot.slane %v887_v22, 1 }
 0x52b   : > { %v893_v44 = vrot.slane %v892_v39, 2 }
 0x52c   : > { %v889_v38 = vadd.f32 %v888_v35, %v887_v22  ;;  %v490_v35 = vsel %vm489_vm7, %v2855_v46, 0.0 }
 0x52d   : > { %v894_v18 = vadd.f32 %v893_v44, %v892_v39  ;;  %v491_v30 = vrot.slane %v490_v35, 4  ;;  %v497_v44 = vsel %vm489_vm7, %v2862_v50, 0.0 }
 0x52e   : > { %v3068_v42 = vsub.f32 %v2971_v37, %v889_v38 }
 0x52f   : > { %v895_v55 = vrot.slane %v894_v18, 1  ;;  %v1058_v2 = vpop.permute.xlu1 %1057  ;;  %v492_v29 = vadd.f32 %v491_v30, %v490_v35 }
 0x530   : > { %v971_v47 = vperm.slane %v3068_v42, 0 }
 0x531   : > { %v896_v21 = vadd.f32 %v895_v55, %v894_v18  ;;  %v493_v38 = vrot.slane %v492_v29, 2 }
 0x533   : > { %v3077_v56 = vsub.f32 %v2984_v43, %v896_v21  ;;  %v494_v39 = vadd.f32 %v493_v38, %v492_v29 }
 0x535   : > { %v972_v57 = vperm.slane %v3077_v56, 0 }
 0x537   : > { %v1148_v28 = vpop.permute.xlu1 %1147 }
 0x56c   : > { %v1004_v52 = vpop.f32.mrf.mxu0 }
 0x56d   : > { %v3071_v53 = vadd.f32 %v1004_v52, %v971_v47  ;;  %v495_v47 = vrot.slane %v494_v39, 1  ;;  %v498_v52 = vrot.slane %v497_v44, 4 }
 0x56f   : > { %v1039_v54 = vmax.f32 %v3071_v53, 0.0  ;;  %v1104_v17 = vpop.permute.xlu2 %1103  ;;  %v496_v18 = vadd.f32 %v495_v47, %v494_v39  ;;  %vm1439_vm10 = vcmp.gt.f32.partialorder %v3071_v53, 0.0 }
 0x571   : > { %2591 = vmatmul.msk.f32.vlgmr.msra.gmra.mxu2 %vm361_vm1, %v1039_v54  ;;  %1284 = vmatpush.msrb.mxu0 %v1039_v54  ;;  %v499_v54 = vadd.f32 %v498_v52, %v497_v44  ;;  %v3102_v55 = vsub.f32 %v2971_v37, %v496_v18 }
 0x572   : > { %1502 = vmatpush.msra.mxu2 %v2783_v8 }
 0x573   : > { %v500_v21 = vrot.slane %v499_v54, 2 }
 0x575   : > { %v501_v46 = vadd.f32 %v500_v21, %v499_v54 }
 0x57f   : > { %v1036_v59 = vpop.f32.mrf.mxu1 }
 0x580   : > { %v3080_v62 = vadd.f32 %v1036_v59, %v972_v57  ;;  %v1161_v57 = vperm.slane %v3102_v55, 0 }
 0x582   : > { %v1040_v10 = vmax.f32 %v3080_v62, 0.0  ;;  %vm1440_vm11 = vcmp.gt.f32.partialorder %v3080_v62, 0.0 }
 0x584   : > { %2596 = vmatmul.msk.f32.vlgmr.msra.gmra.mxu3 %vm361_vm1, %v1040_v10  ;;  %1357 = vmatpush.msrb.mxu1 %v1040_v10 }
 0x585   : > { %1575 = vmatpush.msra.mxu3 %v2786_v9 }
 0x59c   : > { %v1146_v14 = vpop.permute.xlu0 %1145 }
 0x5f4   : > { %v1088_v1 = vpop.f32.mrf.mxu2 }
 0x5f5   : > { %v3085_v3 = vadd.f32 %v1088_v1, %v1058_v2 }
 0x5f7   : > { %v1137_v13 = vmax.f32 %v3085_v3, 0.0  ;;  %vm1213_vm8 = vcmp.gt.f32.partialorder %v3085_v3, 0.0 }
 0x5f9   : > { %v1151_v7 = vmul.f32 %v1146_v14, %v1137_v13  ;;  %v502_v14 = vrot.slane %v501_v46, 1 }
 0x5fb   : > { %v1153_v16 = vsel %vm361_vm1, %v1151_v7, 0.0  ;;  %v503_v50 = vadd.f32 %v502_v14, %v501_v46 }
 0x5fc   : > { %1154 = vadd.xlane.f32.xlu2 %v1153_v16 }
 0x5fd   : > { %v3110_v7 = vsub.f32 %v2984_v43, %v503_v50 }
 0x5ff   : > { %v1162_v37 = vperm.slane %v3110_v7, 0 }
 0x607   : > { %v1134_v19 = vpop.f32.mrf.mxu3 }
 0x608   : > { %v3091_v26 = vadd.f32 %v1134_v19, %v1104_v17 }
 0x60a   : > { %v1138_v15 = vmax.f32 %v3091_v26, 0.0  ;;  %vm1214_vm9 = vcmp.gt.f32.partialorder %v3091_v26, 0.0 }
 0x60c   : > { %v1152_v34 = vmul.f32 %v1148_v28, %v1138_v15 }
 0x60e   : > { %v1156_v22 = vsel %vm361_vm1, %v1152_v34, 0.0 }
 0x60f   : > { %1157 = vadd.xlane.f32.xlu0 %v1156_v22 }
 0x66f   : > { %v1155_v59 = vpop.xlane.xlu2 %1154 }
 0x670   : > { %v1165_v10 = vadd.f32 %v1161_v57, %v1155_v59 }
 0x672   : > { %v1167_v2 = vsub.f32 %v1165_v10, %v2851_v41 }
 0x674   : > { %v3106_v1 = vmul.f32 0.0025, %v1167_v2 }
 0x676   : > { %1173 = vperm.xlu1 %2673, %v3106_v1  }
 0x682   : > { %v1158_v16 = vpop.xlane.xlu0 %1157 }
 0x683   : > { %v1166_v17 = vadd.f32 %v1162_v37, %v1158_v16 }
 0x685   : > { %v1168_v19 = vsub.f32 %v1166_v17, %v2858_v48 }
 0x687   : > { %v3114_v28 = vmul.f32 0.0025, %v1168_v19 }
 0x689   : > { %1178 = vperm.xlu1 %2673, %v3114_v28  }
 0x6e8   : > { %v3117_v34 = vpop.permute.xlu1 %1173 }
 0x6e9   : > { %v1211_v22 = vmul.f32 %v3117_v34, %v1141_v25 }
 0x6eb   : > { %1217 = vrot.lane.b32.xlu1 %v1211_v22, %s2687_s22 }
 0x6fb   : > { %v3123_v43 = vpop.permute.xlu1 %1178 }
 0x6fc   : > { %v1212_v35 = vmul.f32 %v3123_v43, %v1142_v49 }
 0x6fe   : > { %1219 = vrot.lane.b32.xlu1 %v1212_v35, %s2687_s22 }
 0x75d   : > { %v1218_v30 = vpop.permute.xlu1 %1217 }
 0x75e   : > { %v3130_v29 = vsel %vm1213_vm8, %v1218_v30, 0.0 }
 0x75f   : > { %1225 = vxpose.xlu0.b32.start.end [1/1] (short) (narrow) %v3130_v29, 32  ;;  %2605 = vmatmul.msk.f32.vlgmr.msrb.gmra.mxu2 %vm361_vm1, %v3130_v29 }
 0x770   : > { %v1220_v25 = vpop.permute.xlu1 %1219 }
 0x771   : > { %v3136_v38 = vsel %vm1214_vm9, %v1220_v25, 0.0 }
 0x772   : > { %2606 = vmatmul.msk.f32.vlgmr.msrb.gmra.mxu3 %vm361_vm1, %v3136_v38 }
 0x7c6   : > { %2674 = vset.pattern.permute.xlu0 %v2690_v40 }
 0x7e2   : > { %v1409_v49 = vpop.f32.mrf.mxu2 }
 0x7e3   : > { %v3142_v39 = vsel %vm1439_vm10, %v1409_v49, 0.0 }
 0x7e4   : > { %1443 = vxpose.xlu1.b32.start.end [1/1] (short) (narrow) %v3142_v39, 32 }
 0x7f5   : > { %v1436_v44 = vpop.f32.mrf.mxu3 }
 0x7f6   : > { %v3146_v47 = vsel %vm1440_vm11, %v1436_v44, 0.0 }
 0x7f7   : > { %1516 = vxpose.xlu2.b32.start.end [1/1] (short) (narrow) %v3146_v47, 32 }
 0x803   : > { %v1241_v52 = vpop.trf.xlu0 }
 0x804   : > { %2597 = vmatmul.msk.f32.vlgmr.msrb.gmra.mxu0 %vm550_vm4, %v1241_v52 }
 0x80b   : > { %v1242_v18 = vpop.trf.xlu0 }
 0x80c   : > { %2598 = vmatmul.msk.f32.gmra.mxu0 %vm550_vm4, %v1242_v18 }
 0x813   : > { %v1243_v40 = vpop.trf.xlu0 }
 0x814   : > { %2599 = vmatmul.msk.f32.gmra.mxu0 %vm550_vm4, %v1243_v40 }
 0x817   : > { %1298 = vxpose.xlu2.b32.start.end [1/1] (short) (narrow) %v3136_v38, 32 }
 0x81b   : > { %v1244_v53 = vpop.trf.xlu0 }
 0x81c   : > { %2600 = vmatmul.msk.f32.gmra.mxu0 %vm550_vm4, %v1244_v53 }
 0x881   : > { %v3154_v54 = vpop.f32.mrf.mxu0 }
 0x888   : > { %v1459_v62 = vpop.trf.xlu1 }
 0x889   : > { %v1289_v21 = vpop.f32.mrf.mxu0  ;;  %2607 = vmatmul.msk.f32.vlgmr.msra.gmra.mxu2 %vm550_vm4, %v1459_v62 }
 0x890   : > { %v1532_v57 = vpop.trf.xlu2  ;;  %v1460_v59 = vpop.trf.xlu1 }
 0x891   : > { %v1292_v10 = vpop.f32.mrf.mxu0  ;;  %2608 = vmatmul.msk.f32.gmra.mxu2 %vm550_vm4, %v1460_v59  ;;  %2611 = vmatmul.msk.f32.vlgmr.msra.gmra.mxu3 %vm550_vm4, %v1532_v57 }
 0x898   : > { %1623 = vrot.lane.b32.xlu2 %v1292_v10, %s2687_s22  ;;  %v1533_v46 = vpop.trf.xlu2  ;;  %v1461_v2 = vpop.trf.xlu1 }
 0x899   : > { %v1295_v14 = vpop.f32.mrf.mxu0  ;;  %2609 = vmatmul.msk.f32.gmra.mxu2 %vm550_vm4, %v1461_v2  ;;  %2612 = vmatmul.msk.f32.gmra.mxu3 %vm550_vm4, %v1533_v46 }
 0x89a   : > { %1625 = vrot.lane.b32.xlu0 %v1295_v14, %s2687_s22 }
 0x8a0   : > { %v1534_v50 = vpop.trf.xlu2  ;;  %v1462_v37 = vpop.trf.xlu1 }
 0x8a1   : > { %2610 = vmatmul.msk.f32.gmra.mxu2 %vm550_vm4, %v1462_v37  ;;  %2613 = vmatmul.msk.f32.gmra.mxu3 %vm550_vm4, %v1534_v50  ;;  %v1182_v37 = vmul.f32 %v3123_v43, %v1138_v15 }
 0x8a8   : > { %v1535_v16 = vpop.trf.xlu2 }
 0x8a9   : > { %2614 = vmatmul.msk.f32.gmra.mxu3 %vm550_vm4, %v1535_v16 }
 0x8b0   : > { %v1314_v17 = vpop.trf.xlu2 }
 0x8b1   : > { %2601 = vmatmul.msk.f32.vlgmr.msrb.gmra.mxu1 %vm550_vm4, %v1314_v17 }
 0x8b8   : > { %v1315_v19 = vpop.trf.xlu2 }
 0x8b9   : > { %2602 = vmatmul.msk.f32.gmra.mxu1 %vm550_vm4, %v1315_v19  ;;  %v1190_v19 = vsel %vm361_vm1, %v1182_v37, 0.0 }
 0x8c0   : > { %v1316_v22 = vpop.trf.xlu2 }
 0x8c1   : > { %2603 = vmatmul.msk.f32.gmra.mxu1 %vm550_vm4, %v1316_v22 }
 0x8c8   : > { %v1317_v35 = vpop.trf.xlu2 }
 0x8c9   : > { %2604 = vmatmul.msk.f32.gmra.mxu1 %vm550_vm4, %v1317_v35 }
 0x90c   : > { %v1504_v30 = vpop.f32.mrf.mxu2 }
 0x914   : > { %v1507_v25 = vpop.f32.mrf.mxu2  ;;  %v1577_v49 = vpop.f32.mrf.mxu3 }
 0x915   : > { %v3181_v59 = vsub.f32 %v3010_v63, %v1507_v25 }
 0x91c   : > { %v1510_v44 = vpop.f32.mrf.mxu2  ;;  %v1580_v52 = vpop.f32.mrf.mxu3 }
 0x91d   : > { %v3176_v62 = vsub.f32 %v3003_v61, %v1510_v44  ;;  %v3201_v63 = vsub.f32 %v3032_v6, %v1580_v52  ;;  %v1626_v6 = vpop.permute.xlu0 %1625 }
 0x924   : > { %v1513_v18 = vpop.f32.mrf.mxu2  ;;  %v1583_v40 = vpop.f32.mrf.mxu3 }
 0x925   : > { %v3171_v53 = vsub.f32 %v3000_v60, %v1513_v18  ;;  %v3191_v60 = vsub.f32 %v3015_v0, %v1504_v30  ;;  %v3194_v61 = vsub.f32 %v3027_v4, %v1583_v40  ;;  %v3209_v0 = vsub.f32 %v3037_v12, %v1577_v49 }
 0x926   : > { %v3222_v12 = vsub.f32 %v2963_v31, %v1626_v6  ;;  %v1596_v31 = vsel %vm361_vm1, %v3146_v47, 0.0  ;;  %v1191_v30 = vrot.slane %v1190_v19, 4 }
 0x927   : > { %2615 = vmatpush.xpose.msk.msra.mxu0 %vm277_vm0, %v3171_v53  ;;  %v1597_v17 = vrot.slane %v1596_v31, 4 }
 0x92b   : > { %2616 = vmatpush.xpose.msk.msra.mxu0 %vm277_vm0, %v3176_v62 }
 0x92c   : > { %v1586_v57 = vpop.f32.mrf.mxu3 }
 0x92d   : > { %v3184_v10 = vsub.f32 %v3022_v11, %v1586_v57 }
 0x92e   : > { %v1359_v46 = vpop.f32.mrf.mxu1 }
 0x92f   : > { %2617 = vmatpush.xpose.msk.msra.mxu0 %vm277_vm0, %v3181_v59  ;;  %2620 = vmatpush.xpose.msk.msra.mxu1 %vm277_vm0, %v3184_v10 }
 0x933   : > { %2618 = vmatpush.xpose.msk.msra.mxu0 %vm277_vm0, %v3191_v60  ;;  %2621 = vmatpush.xpose.msk.msra.mxu1 %vm277_vm0, %v3194_v61 }
 0x936   : > { %v1362_v11 = vpop.f32.mrf.mxu1  ;;  %2619 = vmatmul.msk.f32.vlgmr.msra.gmra.mxu0 %vm277_vm0, %v2783_v8 }
 0x937   : > { %2622 = vmatpush.xpose.msk.msra.mxu1 %vm277_vm0, %v3201_v63  ;;  %1629 = vrot.lane.b32.xlu0 %v1362_v11, %s2687_s22 }
 0x93b   : > { %2623 = vmatpush.xpose.msk.msra.mxu1 %vm277_vm0, %v3209_v0 }
 0x93e   : > { %v1365_v4 = vpop.f32.mrf.mxu1  ;;  %2624 = vmatmul.msk.f32.vlgmr.msra.gmra.mxu1 %vm277_vm0, %v2786_v9  ;;  %v1624_v9 = vpop.permute.xlu2 %1623 }
 0x93f   : > { %1627 = vrot.lane.b32.xlu0 %v1359_v46, %s2687_s22  ;;  %1631 = vrot.lane.b32.xlu1 %v1365_v4, %s2687_s22  ;;  %v3227_v2 = vsub.f32 %v2953_v27, %v1624_v9 }
 0x946   : > { %v1368_v8 = vpop.f32.mrf.mxu1 }
 0x947   : > { %1633 = vrot.lane.b32.xlu1 %v1368_v8, %s2687_s22 }
 0x94f   : > { %1621 = vrot.lane.b32.xlu1 %v1289_v21, %s2687_s22  ;;  %v1589_v21 = vsel %vm361_vm1, %v3142_v39, 0.0  ;;  %v1598_v39 = vadd.f32 %v1597_v17, %v1596_v31 }
 0x950   : > { %v1590_v14 = vrot.slane %v1589_v21, 4 }
 0x951   : > { %v1599_v44 = vrot.slane %v1598_v39, 2 }
 0x952   : > { %v1591_v50 = vadd.f32 %v1590_v14, %v1589_v21 }
 0x953   : > { %v1600_v47 = vadd.f32 %v1599_v44, %v1598_v39 }
 0x954   : > { %v1592_v16 = vrot.slane %v1591_v50, 2 }
 0x955   : > { %v1601_v40 = vrot.slane %v1600_v47, 1 }
 0x956   : > { %v1593_v35 = vadd.f32 %v1592_v16, %v1591_v50 }
 0x957   : > { %1619 = vrot.lane.b32.xlu1 %v3154_v54, %s2687_s22  ;;  %v1371_v54 = vsel %vm361_vm1, %v3130_v29, 0.0  ;;  %v1192_v29 = vadd.f32 %v1191_v30, %v1190_v19  ;;  %v1602_v6 = vadd.f32 %v1601_v40, %v1600_v47 }
 0x958   : > { %v1372_v27 = vrot.slane %v1371_v54, 4  ;;  %v1594_v49 = vrot.slane %v1593_v35, 1 }
 0x959   : > { %v1193_v43 = vrot.slane %v1192_v29, 2  ;;  %v3255_v50 = vsub.f32 %v3077_v56, %v1602_v6  ;;  %v1378_v56 = vsel %vm361_vm1, %v3136_v38, 0.0 }
 0x95a   : > { %v1373_v22 = vadd.f32 %v1372_v27, %v1371_v54  ;;  %v1595_v15 = vadd.f32 %v1594_v49, %v1593_v35 }
 0x95b   : > { %v1194_v9 = vadd.f32 %v1193_v43, %v1192_v29  ;;  %v1678_v27 = vperm.slane %v3255_v50, 0 }
 0x95c   : > { %v1374_v25 = vrot.slane %v1373_v22, 2  ;;  %v3247_v57 = vsub.f32 %v3068_v42, %v1595_v15  ;;  %v1181_v42 = vmul.f32 %v3117_v34, %v1137_v13  ;;  %v1379_v13 = vrot.slane %v1378_v56, 4 }
 0x95d   : > { %v1195_v54 = vrot.slane %v1194_v9, 1 }
 0x95e   : > { %v1375_v18 = vadd.f32 %v1374_v25, %v1373_v22  ;;  %v1677_v4 = vperm.slane %v3247_v57, 0  ;;  %v1183_v17 = vsel %vm361_vm1, %v1181_v42, 0.0  ;;  %v1380_v39 = vadd.f32 %v1379_v13, %v1378_v56 }
 0x95f   : > { %1761 = vrot.lane.b32.xlu1 %v3222_v12, %s2687_s22  ;;  %v1196_v16 = vadd.f32 %v1195_v54, %v1194_v9  ;;  %v1184_v3 = vrot.slane %v1183_v17, 4 }
 0x960   : > { %v1376_v46 = vrot.slane %v1375_v18, 1  ;;  %v1381_v49 = vrot.slane %v1380_v39, 2 }
 0x961   : > { %v1185_v35 = vadd.f32 %v1184_v3, %v1183_v17  ;;  %v2678_v3 = vld [vmem:[%s2772_s26 + $0x8] sm:$0xff] }
 0x962   : > { %v1377_v8 = vadd.f32 %v1376_v46, %v1375_v18 }
 0x963   : > { %v1186_v25 = vrot.slane %v1185_v35, 2 }
 0x965   : > { %v1187_v47 = vadd.f32 %v1186_v25, %v1185_v35 }
 0x967   : > { %1759 = vrot.lane.b32.xlu1 %v3227_v2, %s2687_s22 }
 0x9a9   : > { %v1630_v52 = vpop.permute.xlu0 %1629 }
 0x9aa   : > { %v3242_v26 = vsub.f32 %v2922_v45, %v1630_v52  ;;  %v1382_v52 = vadd.f32 %v1381_v49, %v1380_v39 }
 0x9ac   : > { %1803 = vrot.lane.b32.xlu1 %v3242_v26, %s2687_s22  ;;  %v1383_v15 = vrot.slane %v1382_v52, 1 }
 0x9ae   : > { %v1384_v46 = vadd.f32 %v1383_v15, %v1382_v52 }
 0x9b1   : > { %v1632_v11 = vpop.permute.xlu1 %1631  ;;  %v1628_v44 = vpop.permute.xlu0 %1627 }
 0x9b2   : > { %v3276_v30 = vsub.f32 %v2909_v23, %v1632_v11  ;;  %v3286_v18 = vsub.f32 %v2987_v32, %v1628_v44 }
 0x9b3   : > { %v1710_v21 = vpop.f32.mrf.mxu0 }
 0x9b4   : > { %v3250_v14 = vadd.f32 %v1710_v21, %v1677_v4  ;;  %1665 = vrot.lane.b32.xlu1 %v1377_v8, %s2689_s5 }
 0x9b6   : > { %v1745_v45 = vmax.f32 %v3250_v14, 0.0  ;;  %vm2145_vm14 = vcmp.gt.f32.partialorder %v3250_v14, 0.0 }
 0x9b8   : > { %1990 = vmatpush.msrb.mxu2 %v1745_v45 }
 0x9b9   : > { %v1634_v31 = vpop.permute.xlu1 %1633 }
 0x9ba   : > { %v3263_v37 = vsub.f32 %v2904_v24, %v1634_v31 }
 0x9bb   : > { %v1742_v19 = vpop.f32.mrf.mxu1 }
 0x9bc   : > { %v3269_v22 = vadd.f32 %v1742_v19, %v1678_v27  ;;  %1655 = vrot.lane.b32.xlu1 %v1196_v16, %s2687_s22  ;;  %1807 = vrot.lane.b32.xlu0 %v3263_v37, %s2687_s22  ;;  %v2677_v19 = vld [vmem:[%s2772_s26] sm:$0xff] }
 0x9be   : > { %v1746_v24 = vmax.f32 %v3269_v22, 0.0  ;;  %vm2146_vm15 = vcmp.gt.f32.partialorder %v3269_v22, 0.0 }
 0x9c0   : > { %2063 = vmatpush.msrb.mxu3 %v1746_v24 }
 0x9c1   : > { %v1622_v34 = vpop.permute.xlu1 %1621 }
 0x9c2   : > { %v3279_v38 = vsub.f32 %v2974_v33, %v1622_v34  ;;  %v1188_v33 = vrot.slane %v1187_v47, 1 }
 0x9c4   : > { %1805 = vrot.lane.b32.xlu0 %v3276_v30, %s2687_s22  ;;  %1757 = vrot.lane.b32.xlu2 %v3279_v38, %s2687_s22  ;;  %v1189_v40 = vadd.f32 %v1188_v33, %v1187_v47 }
 0x9c9   : > { %v1620_v29 = vpop.permute.xlu1 %1619 }
 0x9ca   : > { %v3289_v23 = vsub.f32 %v2943_v20, %v1620_v29 }
 0x9cc   : > { %1801 = vrot.lane.b32.xlu2 %v3286_v18, %s2687_s22  ;;  %1755 = vrot.lane.b32.xlu0 %v3289_v23, %s2687_s22 }
 0x9d1   : > { %v1762_v43 = vpop.permute.xlu1 %1761 }
 0x9d2   : > { %2625 = vmatpush.xpose.msk.msrb.mxu0 %vm361_vm1, %v1762_v43 }
 0x9d4   : > { %1653 = vrot.lane.b32.xlu2 %v1189_v40, %s2687_s22  ;;  %1667 = vrot.lane.b32.xlu0 %v1384_v46, %s2689_s5  ;;  %v1204_v46 = vsel %vm489_vm7, %v3114_v28, 0.0 }
 0x9d9   : > { %v1760_v20 = vpop.permute.xlu1 %1759 }
 0x9da   : > { %2626 = vmatpush.xpose.msk.msrb.mxu0 %vm361_vm1, %v1760_v20 }
 0xa1e   : > { %v1758_v32 = vpop.permute.xlu2 %1757  ;;  %v1804_v11 = vpop.permute.xlu1 %1803 }
 0xa1f   : > { %2627 = vmatpush.xpose.msk.msrb.mxu0 %vm361_vm1, %v1758_v32 }
 0xa26   : > { %v1802_v4 = vpop.permute.xlu2 %1801  ;;  %v1666_v8 = vpop.permute.xlu1 %1665 }
 0xa27   : > { %v3301_v6 = vsub.f32 %v2977_v51, %v1666_v8 }
 0xa29   : > { %v1749_v9 = vperm.slane %v3301_v6, 0 }
 0xa2b   : > { %1763 = vrot.lane.b32.xlu0 %v1749_v9, %s2688_s30 }
 0xa2e   : > { %v1808_v21 = vpop.permute.xlu0 %1807  ;;  %v1654_v54 = vpop.permute.xlu2 %1653 }
 0xa2f   : > { %v3306_v42 = vsub.f32 %v3057_v58, %v1654_v54  ;;  %v1656_v31 = vpop.permute.xlu1 %1655  ;;  %2630 = vmatpush.xpose.msk.msrb.mxu1 %vm361_vm1, %v1808_v21 }
 0xa30   : > { %v3310_v27 = vsub.f32 %v2990_v36, %v1656_v31 }
 0xa31   : > { %v1847_v16 = vperm.slane %v3306_v42, 0 }
 0xa32   : > { %v1848_v51 = vperm.slane %v3310_v27, 0 }
 0xa33   : > { %1851 = vrot.lane.b32.xlu1 %v1847_v16, %s2687_s22 }
 0xa34   : > { %1853 = vrot.lane.b32.xlu0 %v1848_v51, %s2687_s22 }
 0xa36   : > { %v1806_v58 = vpop.permute.xlu0 %1805 }
 0xa37   : > { %2631 = vmatpush.xpose.msk.msrb.mxu1 %vm361_vm1, %v1806_v58 }
 0xa3b   : > { %2632 = vmatpush.xpose.msk.msrb.mxu1 %vm361_vm1, %v1804_v11 }
 0xa3e   : > { %v1756_v36 = vpop.permute.xlu0 %1755 }
 0xa3f   : > { %2628 = vmatpush.xpose.msk.msrb.mxu0 %vm361_vm1, %v1756_v36  ;;  %2633 = vmatpush.xpose.msk.msrb.mxu1 %vm361_vm1, %v1802_v4 }
 0xa42   : > { %2629 = vmatmul.msk.f32.vlgmr.msrb.gmra.mxu0 %vm361_vm1, %v1745_v45  ;;  %2634 = vmatmul.msk.f32.vlgmr.msrb.gmra.mxu1 %vm361_vm1, %v1746_v24 }
 0xa43   : > { %2110 = vmatpush.msra.mxu0 %v1762_v43  ;;  %2137 = vmatpush.msra.mxu1 %v1808_v21  ;;  %v1197_v43 = vsel %vm489_vm7, %v3106_v1, 0.0 }
 0xa44   : > { %v1198_v40 = vrot.slane %v1197_v43, 4 }
 0xa45   : > { %2111 = vmatpush.msra.mxu0 %v1760_v20  ;;  %2138 = vmatpush.msra.mxu1 %v1806_v58 }
 0xa46   : > { %v1668_v17 = vpop.permute.xlu0 %1667  ;;  %v1199_v20 = vadd.f32 %v1198_v40, %v1197_v43 }
 0xa47   : > { %2112 = vmatpush.msra.mxu0 %v1758_v32  ;;  %2139 = vmatpush.msra.mxu1 %v1804_v11  ;;  %v3329_v56 = vsub.f32 %v3045_v5, %v1668_v17  ;;  %v1205_v32 = vrot.slane %v1204_v46, 4 }
 0xa48   : > { %v1200_v11 = vrot.slane %v1199_v20, 2 }
 0xa49   : > { %2113 = vmatpush.msra.mxu0 %v1756_v36  ;;  %2140 = vmatpush.msra.mxu1 %v1802_v4  ;;  %v1750_v13 = vperm.slane %v3329_v56, 0  ;;  %v1206_v4 = vadd.f32 %v1205_v32, %v1204_v46 }
 0xa4a   : > { %v1201_v8 = vadd.f32 %v1200_v11, %v1199_v20 }
 0xa4b   : > { %2208 = vmatpush.msrb.mxu0 %v2677_v19  ;;  %2281 = vmatpush.msrb.mxu1 %v2678_v3  ;;  %v1207_v9 = vrot.slane %v1206_v4, 2 }
 0xa4c   : > { %1809 = vrot.lane.b32.xlu2 %v1750_v13, %s2688_s30  ;;  %v1202_v54 = vrot.slane %v1201_v8, 1 }
 0xa4d   : > { %v1208_v21 = vadd.f32 %v1207_v9, %v1206_v4 }
 0xa4e   : > { %v1203_v31 = vadd.f32 %v1202_v54, %v1201_v8 }
 0xa4f   : > { %v1209_v58 = vrot.slane %v1208_v21, 1 }
 0xa50   : > { %v3347_v36 = vsub.f32 %v3102_v55, %v1203_v31 }
 0xa51   : > { %v1210_v17 = vadd.f32 %v1209_v58, %v1208_v21 }
 0xa52   : > { %v1867_v1 = vperm.slane %v3347_v36, 0 }
 0xa53   : > { %v3351_v19 = vsub.f32 %v3110_v7, %v1210_v17 }
 0xa9d   : > { %v1764_v45 = vpop.permute.xlu0 %1763 }
 0xaa5   : > { %v1852_v29 = vpop.permute.xlu1 %1851 }
 0xaa6   : > { %v1810_v24 = vpop.permute.xlu2 %1809  ;;  %v1854_v44 = vpop.permute.xlu0 %1853 }
 0xabf   : > { %v1794_v34 = vpop.f32.mrf.mxu0  ;;  %v1840_v35 = vpop.f32.mrf.mxu1 }
 0xac0   : > { %v3335_v39 = vadd.f32 %v1794_v34, %v1764_v45  ;;  %v1841_v25 = vadd.f32 %v1840_v35, %v1810_v24  ;;  %v1868_v24 = vperm.slane %v3351_v19, 0 }
 0xac2   : > { %v1843_v5 = vmax.f32 %v3335_v39, 0.0  ;;  %v1844_v49 = vmax.f32 %v1841_v25, 0.0  ;;  %vm1919_vm12 = vcmp.gt.f32.partialorder %v3335_v39, 0.0  ;;  %vm1920_vm13 = vcmp.gt.f32.partialorder %v1841_v25, 0.0 }
 0xac4   : > { %v1858_v52 = vmul.f32 %v1854_v44, %v1844_v49  ;;  %v1857_v47 = vmul.f32 %v1852_v29, %v1843_v5 }
 0xac6   : > { %v1862_v33 = vsel %vm361_vm1, %v1858_v52, 0.0  ;;  %v1859_v15 = vsel %vm361_vm1, %v1857_v47, 0.0 }
 0xac7   : > { %1863 = vadd.xlane.f32.xlu1 %v1862_v33  ;;  %1860 = vadd.xlane.f32.xlu2 %v1859_v15 }
 0xb3a   : > { %v1861_v28 = vpop.xlane.xlu2 %1860  ;;  %v1864_v13 = vpop.xlane.xlu1 %1863 }
 0xb3b   : > { %v1871_v3 = vadd.f32 %v1867_v1, %v1861_v28  ;;  %v1872_v35 = vadd.f32 %v1868_v24, %v1864_v13 }
 0xb3d   : > { %v1873_v45 = vsub.f32 %v1871_v3, %v2851_v41  ;;  %v1874_v55 = vsub.f32 %v1872_v35, %v2858_v48 }
 0xb3f   : > { %v3355_v34 = vmul.f32 0.0025, %v1873_v45  ;;  %v3359_v44 = vmul.f32 0.0025, %v1874_v55 }
 0xb41   : > { %1879 = vperm.xlu0 %2674, %v3355_v34  }
 0xb49   : > { %1884 = vperm.xlu0 %2674, %v3359_v44  }
 0xbb3   : > { %v3362_v7 = vpop.permute.xlu0 %1879 }
 0xbb4   : > { %v1917_v29 = vmul.f32 %v3362_v7, %v1847_v16 }
 0xbb6   : > { %1923 = vrot.lane.b32.xlu0 %v1917_v29, %s2687_s22 }
 0xbbb   : > { %v1885_v41 = vpop.permute.xlu0 %1884 }
 0xbbc   : > { %v1918_v52 = vmul.f32 %v1885_v41, %v1848_v51  ;;  %v1888_v20 = vmul.f32 %v1885_v41, %v1844_v49 }
 0xbbe   : > { %1925 = vrot.lane.b32.xlu0 %v1918_v52, %s2687_s22  ;;  %v1896_v4 = vsel %vm361_vm1, %v1888_v20, 0.0 }
 0xbbf   : > { %v1897_v9 = vrot.slane %v1896_v4, 4 }
 0xbc1   : > { %v1898_v54 = vadd.f32 %v1897_v9, %v1896_v4 }
 0xbc3   : > { %v1899_v17 = vrot.slane %v1898_v54, 2 }
 0xbc5   : > { %v1900_v13 = vadd.f32 %v1899_v17, %v1898_v54 }
 0xbc7   : > { %v1901_v45 = vrot.slane %v1900_v13, 1 }
 0xbc9   : > { %v1902_v24 = vadd.f32 %v1901_v45, %v1900_v13  ;;  %v1887_v45 = vmul.f32 %v3362_v7, %v1843_v5 }
 0xc28   : > { %v1924_v48 = vpop.permute.xlu0 %1923 }
 0xc29   : > { %v1929_v47 = vsel %vm1919_vm12, %v1924_v48, 0.0 }
 0xc2a   : > { %1931 = vxpose.xlu2.b32.start.end [1/1] (short) (narrow) %v1929_v47, 32  ;;  %2643 = vmatmul.msk.f32.vlgmr.msra.gmra.mxu0 %vm361_vm1, %v1929_v47  ;;  %v2077_v16 = vsel %vm361_vm1, %v1929_v47, 0.0 }
 0xc2b   : > { %v2078_v43 = vrot.slane %v2077_v16, 4 }
 0xc2d   : > { %v2079_v40 = vadd.f32 %v2078_v43, %v2077_v16  ;;  %v1910_v16 = vsel %vm489_vm7, %v3359_v44, 0.0 }
 0xc2f   : > { %v2080_v32 = vrot.slane %v2079_v40, 2 }
 0xc30   : > { %v1926_v33 = vpop.permute.xlu0 %1925 }
 0xc31   : > { %v1930_v15 = vsel %vm1920_vm13, %v1926_v33, 0.0  ;;  %v2081_v8 = vadd.f32 %v2080_v32, %v2079_v40  ;;  %v1911_v40 = vrot.slane %v1910_v16, 4 }
 0xc32   : > { %2004 = vxpose.xlu1.b32.start.end [1/1] (short) (narrow) %v1930_v15, 32  ;;  %2644 = vmatmul.msk.f32.vlgmr.msra.gmra.mxu1 %vm361_vm1, %v1930_v15  ;;  %v2084_v51 = vsel %vm361_vm1, %v1930_v15, 0.0 }
 0xc33   : > { %v2085_v46 = vrot.slane %v2084_v51, 4  ;;  %v2082_v21 = vrot.slane %v2081_v8, 1 }
 0xc35   : > { %v2086_v11 = vadd.f32 %v2085_v46, %v2084_v51  ;;  %v2083_v58 = vadd.f32 %v2082_v21, %v2081_v8  ;;  %v1912_v46 = vadd.f32 %v1911_v40, %v1910_v16 }
 0xc37   : > { %v2087_v25 = vrot.slane %v2086_v11, 2  ;;  %v1913_v32 = vrot.slane %v1912_v46, 2 }
 0xc39   : > { %v2088_v31 = vadd.f32 %v2087_v25, %v2086_v11  ;;  %v1914_v4 = vadd.f32 %v1913_v32, %v1912_v46 }
 0xc3b   : > { %v2089_v1 = vrot.slane %v2088_v31, 1  ;;  %v1915_v25 = vrot.slane %v1914_v4, 1 }
 0xc3d   : > { %v2090_v49 = vadd.f32 %v2089_v1, %v2088_v31  ;;  %v1916_v54 = vadd.f32 %v1915_v25, %v1914_v4 }
 0xc3f   : > { %v2380_v1 = vsub.f32 %v3351_v19, %v1916_v54 }
 0xca4   : > { %2371 = vrot.lane.b32.xlu1 %v2083_v58, %s2689_s5 }
 0xca7   : > { %v2115_v28 = vpop.f32.mrf.mxu0 }
 0xca8   : > { %v3379_v3 = vsel %vm2145_vm14, %v2115_v28, 0.0 }
 0xca9   : > { %2149 = vxpose.xlu0.b32.start.end [1/1] (short) (narrow) %v3379_v3, 32  ;;  %v2295_v46 = vsel %vm361_vm1, %v3379_v3, 0.0 }
 0xcaa   : > { %v2296_v32 = vrot.slane %v2295_v46, 4 }
 0xcab   : > { %2373 = vrot.lane.b32.xlu2 %v2090_v49, %s2689_s5 }
 0xcac   : > { %v2297_v4 = vadd.f32 %v2296_v32, %v2295_v46 }
 0xcaf   : > { %v2142_v55 = vpop.f32.mrf.mxu1 }
 0xcb0   : > { %v2148_v29 = vsel %vm2146_vm15, %v2142_v55, 0.0 }
 0xcb1   : > { %v2302_v15 = vsel %vm361_vm1, %v2148_v29, 0.0 }
 0xcb2   : > { %v2303_v43 = vrot.slane %v2302_v15, 4 }
 0xcb3   : > { %2361 = vrot.lane.b32.xlu2 %v1902_v24, %s2687_s22 }
 0xcb4   : > { %v2304_v51 = vadd.f32 %v2303_v43, %v2302_v15 }
 0xcb6   : > { %v2305_v20 = vrot.slane %v2304_v51, 2 }
 0xcb8   : > { %v2306_v11 = vadd.f32 %v2305_v20, %v2304_v51  ;;  %v1903_v20 = vsel %vm489_vm7, %v3355_v34, 0.0 }
 0xcba   : > { %v2307_v8 = vrot.slane %v2306_v11, 1 }
 0xcbc   : > { %v2308_v21 = vadd.f32 %v2307_v8, %v2306_v11  ;;  %v1904_v11 = vrot.slane %v1903_v20, 4 }
 0xcbe   : > { %v2368_v58 = vsub.f32 %v3255_v50, %v2308_v21  ;;  %v1905_v8 = vadd.f32 %v1904_v11, %v1903_v20 }
 0xcc0   : > { %v1906_v25 = vrot.slane %v1905_v8, 2 }
 0xcc2   : > { %v1907_v54 = vadd.f32 %v1906_v25, %v1905_v8 }
 0xcc3   : > { %v1947_v35 = vpop.trf.xlu2 }
 0xcc4   : > { %2635 = vmatmul.msk.f32.vlgmr.msrb.gmra.mxu2 %vm550_vm4, %v1947_v35 }
 0xcc9   : > { %2222 = vxpose.xlu0.b32.start.end [1/1] (short) (narrow) %v2148_v29, 32 }
 0xccb   : > { %v1948_v14 = vpop.trf.xlu2 }
 0xccc   : > { %2636 = vmatmul.msk.f32.gmra.mxu2 %vm550_vm4, %v1948_v14 }
 0xcd3   : > { %v1949_v41 = vpop.trf.xlu2 }
 0xcd4   : > { %2637 = vmatmul.msk.f32.gmra.mxu2 %vm550_vm4, %v1949_v41 }
 0xcd6   : > { %v2020_v52 = vpop.trf.xlu1 }
 0xcd7   : > { %2639 = vmatmul.msk.f32.vlgmr.msrb.gmra.mxu3 %vm550_vm4, %v2020_v52 }
 0xcdb   : > { %v1950_v48 = vpop.trf.xlu2 }
 0xcdc   : > { %2638 = vmatmul.msk.f32.gmra.mxu2 %vm550_vm4, %v1950_v48 }
 0xcde   : > { %v2021_v47 = vpop.trf.xlu1 }
 0xcdf   : > { %2640 = vmatmul.msk.f32.gmra.mxu3 %vm550_vm4, %v2021_v47 }
 0xce6   : > { %v2022_v33 = vpop.trf.xlu1 }
 0xce7   : > { %2641 = vmatmul.msk.f32.gmra.mxu3 %vm550_vm4, %v2022_v33 }
 0xcee   : > { %v2023_v22 = vpop.trf.xlu1 }
 0xcef   : > { %2642 = vmatmul.msk.f32.gmra.mxu3 %vm550_vm4, %v2023_v22 }
 0xd05   : > { %v2374_v9 = vpop.permute.xlu2 %2373 }
 0xd06   : > { %v2378_v31 = vsub.f32 %v3329_v56, %v2374_v9  ;;  %v1889_v56 = vsel %vm361_vm1, %v1887_v45, 0.0  ;;  %v2298_v9 = vrot.slane %v2297_v4, 2 }
 0xd07   : > { %v1890_v50 = vrot.slane %v1889_v56, 4 }
 0xd08   : > { %v2407_v28 = vsel %vm361_vm1, %v2368_v58, %v2378_v31  ;;  %v2299_v21 = vadd.f32 %v2298_v9, %v2297_v4  ;;  %v1908_v58 = vrot.slane %v1907_v54, 1 }
 0xd09   : > { %v1891_v24 = vadd.f32 %v1890_v50, %v1889_v56 }
 0xd0a   : > { %v2300_v31 = vrot.slane %v2299_v21, 1 }
 0xd0b   : > { %v1892_v35 = vrot.slane %v1891_v24, 2 }
 0xd0d   : > { %v2362_v17 = vpop.permute.xlu2 %2361  ;;  %v1893_v55 = vadd.f32 %v1892_v35, %v1891_v24 }
 0xd0e   : > { %v2366_v44 = vsub.f32 %v3310_v27, %v2362_v17 }
 0xd0f   : > { %v1894_v19 = vrot.slane %v1893_v55, 1 }
 0xd10   : > { %v2409_v49 = vsel %vm277_vm0, %v2407_v28, %v2366_v44  ;;  %v2301_v44 = vadd.f32 %v2300_v31, %v2299_v21 }
 0xd11   : > { %v3403_v13 = vsel %vm2389_vm2, %v2409_v49, %v2380_v1  ;;  %v1895_v14 = vadd.f32 %v1894_v19, %v1893_v55  ;;  %v1909_v1 = vadd.f32 %v1908_v58, %v1907_v54 }
 0xd12   : > { %v2367_v3 = vsub.f32 %v3247_v57, %v2301_v44  ;;  %v2414_v57 = vsel %vm2412_vm3, %v3403_v13, 0.0 }
 0xd13   : > { %v2379_v45 = vsub.f32 %v3347_v36, %v1909_v1  ;;  %2416 = vst [vmem:[%s257_s8 + $0x1] sm:$0x1] %v2414_v57 }
 0xd16   : > { %v2372_v17 = vpop.permute.xlu1 %2371 }
 0xd17   : > { %v2377_v28 = vsub.f32 %v3301_v6, %v2372_v17 }
 0xd19   : > { %v2406_v56 = vsel %vm361_vm1, %v2367_v3, %v2377_v28 }
 0xd47   : > { %v1992_v27 = vpop.f32.mrf.mxu2 }
 0xd48   : > { %2325 = vrot.lane.b32.xlu2 %v1992_v27, %s2687_s22 }
 0xd4d   : > { %v2165_v29 = vpop.trf.xlu0 }
 0xd4e   : > { %2645 = vmatmul.msk.f32.vlgmr.msrb.gmra.mxu0 %vm550_vm4, %v2165_v29 }
 0xd4f   : > { %2359 = vrot.lane.b32.xlu0 %v1895_v14, %s2687_s22  ;;  %v1995_v41 = vpop.f32.mrf.mxu2 }
 0xd55   : > { %v2166_v39 = vpop.trf.xlu0 }
 0xd56   : > { %2646 = vmatmul.msk.f32.gmra.mxu0 %vm550_vm4, %v2166_v39 }
 0xd57   : > { %v1998_v52 = vpop.f32.mrf.mxu2 }
 0xd5a   : > { %v2065_v5 = vpop.f32.mrf.mxu3 }
 0xd5b   : > { %2333 = vrot.lane.b32.xlu1 %v2065_v5, %s2687_s22 }
 0xd5d   : > { %v2167_v7 = vpop.trf.xlu0 }
 0xd5e   : > { %2647 = vmatmul.msk.f32.gmra.mxu0 %vm550_vm4, %v2167_v7 }
 0xd5f   : > { %v2001_v33 = vpop.f32.mrf.mxu2 }
 0xd62   : > { %v2068_v48 = vpop.f32.mrf.mxu3 }
 0xd63   : > { %2327 = vrot.lane.b32.xlu1 %v1995_v41, %s2687_s22  ;;  %2335 = vrot.lane.b32.xlu2 %v2068_v48, %s2687_s22 }
 0xd65   : > { %v2168_v47 = vpop.trf.xlu0 }
 0xd66   : > { %2648 = vmatmul.msk.f32.gmra.mxu0 %vm550_vm4, %v2168_v47 }
 0xd6a   : > { %v2071_v22 = vpop.f32.mrf.mxu3 }
 0xd6b   : > { %2331 = vrot.lane.b32.xlu1 %v2001_v33, %s2687_s22  ;;  %2329 = vrot.lane.b32.xlu2 %v1998_v52, %s2687_s22 }
 0xd6d   : > { %v2238_v15 = vpop.trf.xlu0 }
 0xd6e   : > { %2649 = vmatmul.msk.f32.vlgmr.msrb.gmra.mxu1 %vm550_vm4, %v2238_v15 }
 0xd72   : > { %v2074_v16 = vpop.f32.mrf.mxu3 }
 0xd73   : > { %2337 = vrot.lane.b32.xlu1 %v2071_v22, %s2687_s22  ;;  %2339 = vrot.lane.b32.xlu2 %v2074_v16, %s2687_s22 }
 0xd75   : > { %v2239_v43 = vpop.trf.xlu0 }
 0xd76   : > { %2650 = vmatmul.msk.f32.gmra.mxu1 %vm550_vm4, %v2239_v43 }
 0xd7d   : > { %v2240_v40 = vpop.trf.xlu0 }
 0xd7e   : > { %2651 = vmatmul.msk.f32.gmra.mxu1 %vm550_vm4, %v2240_v40 }
 0xd85   : > { %v2241_v51 = vpop.trf.xlu0 }
 0xd86   : > { %2652 = vmatmul.msk.f32.gmra.mxu1 %vm550_vm4, %v2241_v51 }
 0xda2   : > { %v2326_v35 = vpop.permute.xlu2 %2325 }
 0xda3   : > { %v2349_v36 = vsub.f32 %v3289_v23, %v2326_v35 }
 0xdbd   : > { %v2336_v13 = vpop.permute.xlu2 %2335 }
 0xdbe   : > { %v2354_v32 = vsub.f32 %v3242_v26, %v2336_v13 }
 0xdc1   : > { %v2360_v49 = vpop.permute.xlu0 %2359 }
 0xdc2   : > { %v2365_v34 = vsub.f32 %v3306_v42, %v2360_v49 }
 0xdc4   : > { %v2408_v50 = vsel %vm277_vm0, %v2406_v56, %v2365_v34 }
 0xdc5   : > { %v2410_v24 = vsel %vm2389_vm2, %v2408_v50, %v2379_v45  ;;  %v2330_v5 = vpop.permute.xlu2 %2329 }
 0xdc6   : > { %v2413_v6 = vsel %vm2412_vm3, %v2410_v24, 0.0  ;;  %v2351_v48 = vsub.f32 %v3227_v2, %v2330_v5 }
 0xdc7   : > { %2415 = vst [vmem:[%s257_s8] sm:$0x1] %v2413_v6 }
 0xdcb   : > { %v2210_v42 = vpop.f32.mrf.mxu0 }
 0xdcc   : > { %v2309_v55 = vsub.f32 %v3191_v60, %v2210_v42 }
 0xdcd   : > { %v2334_v27 = vpop.permute.xlu1 %2333  ;;  %v2340_v26 = vpop.permute.xlu2 %2339 }
 0xdce   : > { %v2381_v19 = vsel %vm277_vm0, %v2309_v55, %v2349_v36 }
 0xdcf   : > { %v2390_v29 = vsel %vm2389_vm2, %v2381_v19, 0.0 }
 0xdd0   : > { %2398 = vst [vmem:[%s3449_s11] sm:$0xff] %v2390_v29 }
 0xdd3   : > { %v2213_v14 = vpop.f32.mrf.mxu0 }
 0xdd4   : > { %v2310_v60 = vsub.f32 %v3181_v59, %v2213_v14 }
 0xdd5   : > { %v2328_v23 = vpop.permute.xlu1 %2327 }
 0xdd6   : > { %v2350_v41 = vsub.f32 %v3279_v38, %v2328_v23 }
 0xdd8   : > { %v2382_v39 = vsel %vm277_vm0, %v2310_v60, %v2350_v41 }
 0xdd9   : > { %v2391_v7 = vsel %vm2389_vm2, %v2382_v39, 0.0 }
 0xdda   : > { %2399 = vst [vmem:[%s3449_s11 + $0x8] sm:$0xff] %v2391_v7 }
 0xddb   : > { %v2216_v52 = vpop.f32.mrf.mxu0 }
 0xddc   : > { %v2311_v47 = vsub.f32 %v3176_v62, %v2216_v52  ;;  %v2353_v62 = vsub.f32 %v3286_v18, %v2334_v27 }
 0xddd   : > { %v2332_v59 = vpop.permute.xlu1 %2331 }
 0xdde   : > { %v2383_v33 = vsel %vm277_vm0, %v2311_v47, %v2351_v48  ;;  %v2352_v15 = vsub.f32 %v3222_v12, %v2332_v59 }
 0xddf   : > { %v2392_v22 = vsel %vm2389_vm2, %v2383_v33, 0.0 }
 0xde0   : > { %2400 = vst [vmem:[%s3449_s11 + $0x10] sm:$0xff] %v2392_v22 }
 0xde3   : > { %v2219_v38 = vpop.f32.mrf.mxu0 }
 0xde4   : > { %v2312_v16 = vsub.f32 %v3171_v53, %v2219_v38 }
 0xde5   : > { %v2338_v18 = vpop.permute.xlu1 %2337 }
 0xde6   : > { %v2384_v43 = vsel %vm277_vm0, %v2312_v16, %v2352_v15 }
 0xde7   : > { %v2393_v40 = vsel %vm2389_vm2, %v2384_v43, 0.0 }
 0xde8   : > { %2401 = vst [vmem:[%s3449_s11 + $0x18] sm:$0xff] %v2393_v40 }
 0xdeb   : > { %v2283_v2 = vpop.f32.mrf.mxu1 }
 0xdec   : > { %v2313_v51 = vsub.f32 %v3209_v0, %v2283_v2  ;;  %v2355_v0 = vsub.f32 %v3276_v30, %v2338_v18 }
 0xdee   : > { %v2385_v46 = vsel %vm277_vm0, %v2313_v51, %v2353_v62 }
 0xdef   : > { %v2394_v20 = vsel %vm2389_vm2, %v2385_v46, 0.0 }
 0xdf0   : > { %2402 = vst [vmem:[%s3449_s11 + $0x20] sm:$0xff] %v2394_v20 }
 0xdf3   : > { %v2286_v12 = vpop.f32.mrf.mxu1 }
 0xdf4   : > { %v2314_v53 = vsub.f32 %v3201_v63, %v2286_v12  ;;  %v2356_v63 = vsub.f32 %v3263_v37, %v2340_v26 }
 0xdf6   : > { %v2386_v11 = vsel %vm277_vm0, %v2314_v53, %v2354_v32 }
 0xdf7   : > { %v2395_v4 = vsel %vm2389_vm2, %v2386_v11, 0.0 }
 0xdf8   : > { %2403 = vst [vmem:[%s3449_s11 + $0x28] sm:$0xff] %v2395_v4 }
 0xdfb   : > { %v2289_v8 = vpop.f32.mrf.mxu1 }
 0xdfc   : > { %v2315_v9 = vsub.f32 %v3194_v61, %v2289_v8 }
 0xdfe   : > { %v2387_v25 = vsel %vm277_vm0, %v2315_v9, %v2355_v0 }
 0xdff   : > { %v2396_v21 = vsel %vm2389_vm2, %v2387_v25, 0.0 }
 0xe00   : > { %2404 = vst [vmem:[%s3449_s11 + $0x30] sm:$0xff] %v2396_v21 }
 0xe03   : > { %v2292_v54 = vpop.f32.mrf.mxu1 }
 0xe04   : > { %v2316_v31 = vsub.f32 %v3184_v10, %v2292_v54 }
 0xe06   : > { %v2388_v58 = vsel %vm277_vm0, %v2316_v31, %v2356_v63 }
 0xe07   : > { %v2397_v17 = vsel %vm2389_vm2, %v2388_v58, 0.0 }
 0xe08   : > { %2405 = vst [vmem:[%s3449_s11 + $0x38] sm:$0xff] %v2397_v17 }
 0xe09 PF: > { %s15_s15 = sadd.s32 1, %s2685_s15  }
 0xe0a   : > { %p12_p4 = scmp.ge.s32.totalorder %s15_s15, 4  }
 0xe0c   :  { %14 = sbr.rel (!%p12_p4) target bundleno = 1 (0x1), region = 80 }

</bundles_post_ra>
